<compile_context>
chip_gen: v6e
topology: v6e:2x2x1
jax: 0.10.0
libtpu: 0.0.40
codegen_flags: <defaults>
</compile_context>

<pallas_src>
import functools
import math

import jax
import jax.numpy as jnp
import numpy as np
from jax import lax
from jax.experimental import pallas as pl
from jax.experimental.pallas import tpu as pltpu

JOINT_DIM = 7
BN_EPS = 1e-5
HEADS1_W = 288 + 288 + 160  # fused first-layer width (mean | log_var | joint)


def _dot_t(a, w):
    """a: (N, in), w: (out, in) -> (N, out)  (== a @ w.T), f32 accumulate on MXU."""
    return lax.dot_general(a, w, (((1,), (1,)), ((), ())),
                           preferred_element_type=jnp.float32)


def _kernel(x_ref, wih0_ref, wrnn_ref, wheads1_ref, wz2_ref,
            wj2_ref, wj3_ref, wj4_ref, b_ref, out_ref,
            *, B, T, H, z_dim, joint_dim, num_layers):
    def bias(row, width):
        return b_ref[row:row + 1, :width]                 # (1, width), static slice

    def relu(v):
        return jnp.maximum(v, 0.0)

    def batchnorm(v, g, b):
        mu = jnp.mean(v, axis=0, keepdims=True)
        var = jnp.mean((v - mu) ** 2, axis=0, keepdims=True)   # biased variance
        return (v - mu) * lax.rsqrt(var + BN_EPS) * g + b

    x = x_ref[...]                                        # (T*B, F), time-major

    # ---------- multi-layer tanh RNN (time-major, hoisted input projection) ----------
    layer_in = x
    for l in range(num_layers):
        if l == 0:
            wih = wih0_ref[...]                           # (H, F)
        else:
            r0 = num_layers * H + (l - 1) * H
            wih = wrnn_ref[r0:r0 + H, :]                  # (H, H)
        whh = wrnn_ref[l * H:(l + 1) * H, :]              # (H, H)

        # one bulk matmul over all T*B rows; bias = (bih + bhh) folded host-side
        pre = _dot_t(layer_in, wih) + bias(l, H)          # (T*B, H)

        h = jnp.zeros((B, H), jnp.float32)
        outs = []
        for t in range(T):                                # serial chain: 1 small matmul/step
            h = jnp.tanh(pre[t * B:(t + 1) * B, :] + _dot_t(h, whh))
            outs.append(h)
        layer_in = jnp.concatenate(outs, axis=0)          # (T*B, H), time-major

    X2 = layer_in                                         # (T*B, H)

    # ---------- fused first layer of the three heads ----------
    hp = _dot_t(X2, wheads1_ref[...]) + bias(num_layers, HEADS1_W)   # (T*B, 736)
    mh = relu(hp[:, :288])                                # mean head hidden
    vh = relu(hp[:, 288:576])                             # log_var head hidden
    j1 = hp[:, 576:HEADS1_W]                              # joint head pre-BN

    wz2 = wz2_ref[...]                                    # (2*z_dim, 288)
    mean_o = _dot_t(mh, wz2[:z_dim, :]) + bias(num_layers + 1, z_dim)
    logvar_o = _dot_t(vh, wz2[z_dim:2 * z_dim, :]) + bias(num_layers + 2, z_dim)

    # ---------- joint head tail ----------
    h1 = relu(batchnorm(j1, bias(num_layers + 3, 160), bias(num_layers + 4, 160)))
    h2 = relu(batchnorm(_dot_t(h1, wj2_ref[...]) + bias(num_layers + 5, 80),
                        bias(num_layers + 6, 80), bias(num_layers + 7, 80)))
    h3 = _dot_t(h2, wj3_ref[...]) + bias(num_layers + 8, 30)
    h4 = _dot_t(h3, wj4_ref[...]) + bias(num_layers + 9, joint_dim)

    # single packed, lane-concatenated output store
    out_ref[...] = jnp.concatenate([mean_o, logvar_o, h4], axis=1)


class RNNPallas:
    """JAX/Pallas port of RNN_ (forward pass)."""

    def __init__(self, input_size, hidden_size, num_layers, z_dim, key):
        self.input_size = input_size
        self.hidden_size = hidden_size
        self.num_layers = num_layers
        self.z_dim = z_dim
        self.joint_dim = JOINT_DIM
        H = hidden_size

        def uniform(k, shape, fan_in):
            bound = 1.0 / math.sqrt(fan_in)
            return jax.random.uniform(k, shape, jnp.float32, -bound, bound)

        keys = iter(jax.random.split(key, 64))

        # ----- RNN parameters (PyTorch nn.RNN init: U(-1/sqrt(H), 1/sqrt(H))) -----
        wih, whh, b_rnn = [], [], []
        for l in range(num_layers):
            in_l = input_size if l == 0 else H
            wih.append(uniform(next(keys), (H, in_l), H))
            whh.append(uniform(next(keys), (H, H), H))
            bih = uniform(next(keys), (H,), H)
            bhh = uniform(next(keys), (H,), H)
            b_rnn.append(bih + bhh)                       # fold the two biases

        # ----- head parameters (nn.Linear init) -----
        Wm1 = uniform(next(keys), (288, H), H); bm1 = uniform(next(keys), (288,), H)
        Wm2 = uniform(next(keys), (z_dim, 288), 288); bm2 = uniform(next(keys), (z_dim,), 288)
        Wv1 = uniform(next(keys), (288, H), H); bv1 = uniform(next(keys), (288,), H)
        Wv2 = uniform(next(keys), (z_dim, 288), 288); bv2 = uniform(next(keys), (z_dim,), 288)
        Wj1 = uniform(next(keys), (160, H), H); bj1 = uniform(next(keys), (160,), H)
        g1 = jnp.ones((160,), jnp.float32); be1 = jnp.zeros((160,), jnp.float32)
        Wj2 = uniform(next(keys), (80, 160), 160); bj2 = uniform(next(keys), (80,), 160)
        g2 = jnp.ones((80,), jnp.float32); be2 = jnp.zeros((80,), jnp.float32)
        Wj3 = uniform(next(keys), (30, 80), 80); bj3 = uniform(next(keys), (30,), 80)
        Wj4 = uniform(next(keys), (self.joint_dim, 30), 30)
        bj4 = uniform(next(keys), (self.joint_dim,), 30)

        # ----- host-side packing (few big inputs instead of ~35 tiny ones) -----
        self.w_ih0 = wih[0]                                       # (H, F)
        self.w_rnn = jnp.concatenate(whh + wih[1:], axis=0)        # ((2L-1)*H, H)
        self.w_heads1 = jnp.concatenate([Wm1, Wv1, Wj1], axis=0)   # (736, H)
        self.w_z2 = jnp.concatenate([Wm2, Wv2], axis=0)            # (2*z_dim, 288)
        self.w_j2, self.w_j3, self.w_j4 = Wj2, Wj3, Wj4

        bias_rows = list(b_rnn) + [
            jnp.concatenate([bm1, bv1, bj1]),                      # fused heads-1 bias
            bm2, bv2, g1, be1, bj2, g2, be2, bj3, bj4]
        maxw = max(int(r.shape[0]) for r in bias_rows)
        self.bias_tab = jnp.stack(
            [jnp.pad(r, (0, maxw - r.shape[0])) for r in bias_rows],
            axis=0).astype(jnp.float32)                            # (L+10, maxw)

    @functools.partial(jax.jit, static_argnums=0)
    def forward(self, z_i_t, z_i_g, j_pre):
        B = j_pre.shape[0]
        z_i_t = z_i_t.reshape(B, -1, self.z_dim)
        z_i_g = z_i_g.reshape(B, -1, self.z_dim)
        j_pre = j_pre.reshape(B, -1, self.joint_dim)
        x = jnp.concatenate([z_i_t, z_i_g, j_pre], axis=2).astype(jnp.float32)
        T = x.shape[1]

        # time-major: (T*B, F), row index = t*B + b
        x_tm = jnp.transpose(x, (1, 0, 2)).reshape(T * B, -1)

        C = 2 * self.z_dim + self.joint_dim
        kernel = functools.partial(
            _kernel, B=B, T=T, H=self.hidden_size, z_dim=self.z_dim,
            joint_dim=self.joint_dim, num_layers=self.num_layers)

        vmem = pl.BlockSpec(memory_space=pltpu.MemorySpace.VMEM)
        out = pl.pallas_call(
            kernel,
            out_shape=jax.ShapeDtypeStruct((T * B, C), jnp.float32),
            in_specs=[vmem] * 9,
            out_specs=vmem,
        )(x_tm, self.w_ih0, self.w_rnn, self.w_heads1, self.w_z2,
          self.w_j2, self.w_j3, self.w_j4, self.bias_tab)

        out = out.reshape(T, B, C).transpose(1, 0, 2)              # (B, T, C)
        mean = out[:, :, :self.z_dim]
        log_var = out[:, :, self.z_dim:2 * self.z_dim]
        j_next = out[:, :, 2 * self.z_dim:]
        return mean, log_var, j_next

    # TODO(synk): `autoregress` (carried hidden state h as input/output) not implemented;
    # only the forward pass with h0 = 0 is ported.

    # ----- pure-JAX reference for correctness checking -----
    def reference(self, z_i_t, z_i_g, j_pre):
        B = j_pre.shape[0]
        H, L, zd, jd = self.hidden_size, self.num_layers, self.z_dim, self.joint_dim
        x = jnp.concatenate([z_i_t.reshape(B, -1, zd),
                             z_i_g.reshape(B, -1, zd),
                             j_pre.reshape(B, -1, jd)], axis=2).astype(jnp.float32)
        T = x.shape[1]
        bias_tab = self.bias_tab

        layer_in = x                                               # (B, T, *)
        for l in range(L):
            wih = self.w_ih0 if l == 0 else self.w_rnn[L * H + (l - 1) * H: L * H + l * H]
            whh = self.w_rnn[l * H:(l + 1) * H]
            b = bias_tab[l, :H]
            h = jnp.zeros((B, H), jnp.float32)
            outs = []
            for t in range(T):
                h = jnp.tanh(layer_in[:, t, :] @ wih.T + b + h @ whh.T)
                outs.append(h)
            layer_in = jnp.stack(outs, axis=1)                     # (B, T, H)

        X2 = layer_in.reshape(B * T, H)
        hp = X2 @ self.w_heads1.T + bias_tab[L, :HEADS1_W]
        mh = jnp.maximum(hp[:, :288], 0.0)
        vh = jnp.maximum(hp[:, 288:576], 0.0)
        j1 = hp[:, 576:HEADS1_W]
        mean = (mh @ self.w_z2[:zd].T + bias_tab[L + 1, :zd]).reshape(B, T, zd)
        logv = (vh @ self.w_z2[zd:2 * zd].T + bias_tab[L + 2, :zd]).reshape(B, T, zd)

        def bn(v, g, b):
            mu = jnp.mean(v, axis=0, keepdims=True)
            var = jnp.mean((v - mu) ** 2, axis=0, keepdims=True)
            return (v - mu) * lax.rsqrt(var + BN_EPS) * g + b

        h1 = jnp.maximum(bn(j1, bias_tab[L + 3, :160], bias_tab[L + 4, :160]), 0.0)
        h2 = jnp.maximum(bn(h1 @ self.w_j2.T + bias_tab[L + 5, :80],
                            bias_tab[L + 6, :80], bias_tab[L + 7, :80]), 0.0)
        h3 = h2 @ self.w_j3.T + bias_tab[L + 8, :30]
        h4 = (h3 @ self.w_j4.T + bias_tab[L + 9, :jd]).reshape(B, T, jd)
        return mean, logv, h4


if __name__ == "__main__":
    B, T = 2, 8
    z_dim = 4
    joint_dim = JOINT_DIM
    hidden_size = 32
    num_layers = 2
    input_size = 2 * z_dim + joint_dim  # 15

    key = jax.random.PRNGKey(0)
    k_model, k1, k2, k3 = jax.random.split(key, 4)

    model = RNNPallas(input_size, hidden_size, num_layers, z_dim, k_model)

    z_i_t = jax.random.normal(k1, (B, T * z_dim), jnp.float32)
    z_i_g = jax.random.normal(k2, (B, T * z_dim), jnp.float32)
    j_pre = jax.random.normal(k3, (B, T * joint_dim), jnp.float32)

    mean, log_var, j_next = model.forward(z_i_t, z_i_g, j_pre)
    jax.block_until_ready((mean, log_var, j_next))

    assert mean.shape == (B, T, z_dim)
    assert log_var.shape == (B, T, z_dim)
    assert j_next.shape == (B, T, joint_dim)

    # numerical check against a pure-JAX reference of the same math
    r_mean, r_logv, r_jnext = model.reference(z_i_t, z_i_g, j_pre)
    np.testing.assert_allclose(np.asarray(mean), np.asarray(r_mean), rtol=2e-3, atol=2e-3)
    np.testing.assert_allclose(np.asarray(log_var), np.asarray(r_logv), rtol=2e-3, atol=2e-3)
    np.testing.assert_allclose(np.asarray(j_next), np.asarray(r_jnext), rtol=2e-3, atol=2e-3)

    print("KERNEL_OK")
</pallas_src>

<mosaic_0001>
module attributes {stable_mosaic.version = 11 : i64} {
  func.func @_kernel(%arg0: memref<16x15xf32, #tpu.memory_space<vmem>>, %arg1: memref<32x15xf32, #tpu.memory_space<vmem>>, %arg2: memref<96x32xf32, #tpu.memory_space<vmem>>, %arg3: memref<736x32xf32, #tpu.memory_space<vmem>>, %arg4: memref<8x288xf32, #tpu.memory_space<vmem>>, %arg5: memref<80x160xf32, #tpu.memory_space<vmem>>, %arg6: memref<30x80xf32, #tpu.memory_space<vmem>>, %arg7: memref<7x30xf32, #tpu.memory_space<vmem>>, %arg8: memref<12x736xf32, #tpu.memory_space<vmem>>, %arg9: memref<16x15xf32, #tpu.memory_space<vmem>>) attributes {dimension_semantics = [], scalar_prefetch = 0 : i64, scratch_operands = 0 : i64, tpu.core_type = #tpu.core_type<tc>} {
    %c0 = arith.constant 0 : index
    %c0_0 = arith.constant 0 : index
    %0 = vector.load %arg0[%c0, %c0_0] : memref<16x15xf32, #tpu.memory_space<vmem>>, vector<16x15xf32>
    %c0_1 = arith.constant 0 : index
    %c0_2 = arith.constant 0 : index
    %1 = vector.load %arg1[%c0_1, %c0_2] : memref<32x15xf32, #tpu.memory_space<vmem>>, vector<32x15xf32>
    %c0_3 = arith.constant 0 : index
    %c0_4 = arith.constant 0 : index
    %2 = vector.load %arg2[%c0_3, %c0_4] : memref<96x32xf32, #tpu.memory_space<vmem>>, vector<32x32xf32>
    %cst = arith.constant dense<0.000000e+00> : vector<16x32xf32>
    %3 = tpu.matmul %0, %1, %cst {dimension_numbers = #tpu.dot_dimension_numbers<[1], [1], [0], [0], [0, 0, 1, 0], [], []>} : vector<16x15xf32>, vector<32x15xf32>, vector<16x32xf32> -> vector<16x32xf32>
    %c0_5 = arith.constant 0 : index
    %c0_6 = arith.constant 0 : index
    %4 = vector.load %arg8[%c0_5, %c0_6] : memref<12x736xf32, #tpu.memory_space<vmem>>, vector<1x32xf32>
    %5 = vector.broadcast %4 : vector<1x32xf32> to vector<16x32xf32>
    %6 = arith.addf %3, %5 : vector<16x32xf32>
    %cst_7 = arith.constant 0.000000e+00 : f32
    %7 = vector.broadcast %cst_7 : f32 to vector<2x32xf32>
    %8 = vector.extract_strided_slice %6 {offsets = [0, 0], sizes = [2, 32], strides = [1, 1]} : vector<16x32xf32> to vector<2x32xf32>
    %cst_8 = arith.constant dense<0.000000e+00> : vector<2x32xf32>
    %9 = tpu.matmul %7, %2, %cst_8 {dimension_numbers = #tpu.dot_dimension_numbers<[1], [1], [0], [0], [0, 0, 1, 0], [], []>} : vector<2x32xf32>, vector<32x32xf32>, vector<2x32xf32> -> vector<2x32xf32>
    %10 = arith.addf %8, %9 : vector<2x32xf32>
    %11 = math.tanh %10 : vector<2x32xf32>
    %12 = vector.extract_strided_slice %6 {offsets = [2, 0], sizes = [2, 32], strides = [1, 1]} : vector<16x32xf32> to vector<2x32xf32>
    %cst_9 = arith.constant dense<0.000000e+00> : vector<2x32xf32>
    %13 = tpu.matmul %11, %2, %cst_9 {dimension_numbers = #tpu.dot_dimension_numbers<[1], [1], [0], [0], [0, 0, 1, 0], [], []>} : vector<2x32xf32>, vector<32x32xf32>, vector<2x32xf32> -> vector<2x32xf32>
    %14 = arith.addf %12, %13 : vector<2x32xf32>
    %15 = math.tanh %14 : vector<2x32xf32>
    %16 = vector.extract_strided_slice %6 {offsets = [4, 0], sizes = [2, 32], strides = [1, 1]} : vector<16x32xf32> to vector<2x32xf32>
    %cst_10 = arith.constant dense<0.000000e+00> : vector<2x32xf32>
    %17 = tpu.matmul %15, %2, %cst_10 {dimension_numbers = #tpu.dot_dimension_numbers<[1], [1], [0], [0], [0, 0, 1, 0], [], []>} : vector<2x32xf32>, vector<32x32xf32>, vector<2x32xf32> -> vector<2x32xf32>
    %18 = arith.addf %16, %17 : vector<2x32xf32>
    %19 = math.tanh %18 : vector<2x32xf32>
    %20 = vector.extract_strided_slice %6 {offsets = [6, 0], sizes = [2, 32], strides = [1, 1]} : vector<16x32xf32> to vector<2x32xf32>
    %cst_11 = arith.constant dense<0.000000e+00> : vector<2x32xf32>
    %21 = tpu.matmul %19, %2, %cst_11 {dimension_numbers = #tpu.dot_dimension_numbers<[1], [1], [0], [0], [0, 0, 1, 0], [], []>} : vector<2x32xf32>, vector<32x32xf32>, vector<2x32xf32> -> vector<2x32xf32>
    %22 = arith.addf %20, %21 : vector<2x32xf32>
    %23 = math.tanh %22 : vector<2x32xf32>
    %24 = vector.extract_strided_slice %6 {offsets = [8, 0], sizes = [2, 32], strides = [1, 1]} : vector<16x32xf32> to vector<2x32xf32>
    %cst_12 = arith.constant dense<0.000000e+00> : vector<2x32xf32>
    %25 = tpu.matmul %23, %2, %cst_12 {dimension_numbers = #tpu.dot_dimension_numbers<[1], [1], [0], [0], [0, 0, 1, 0], [], []>} : vector<2x32xf32>, vector<32x32xf32>, vector<2x32xf32> -> vector<2x32xf32>
    %26 = arith.addf %24, %25 : vector<2x32xf32>
    %27 = math.tanh %26 : vector<2x32xf32>
    %28 = vector.extract_strided_slice %6 {offsets = [10, 0], sizes = [2, 32], strides = [1, 1]} : vector<16x32xf32> to vector<2x32xf32>
    %cst_13 = arith.constant dense<0.000000e+00> : vector<2x32xf32>
    %29 = tpu.matmul %27, %2, %cst_13 {dimension_numbers = #tpu.dot_dimension_numbers<[1], [1], [0], [0], [0, 0, 1, 0], [], []>} : vector<2x32xf32>, vector<32x32xf32>, vector<2x32xf32> -> vector<2x32xf32>
    %30 = arith.addf %28, %29 : vector<2x32xf32>
    %31 = math.tanh %30 : vector<2x32xf32>
    %32 = vector.extract_strided_slice %6 {offsets = [12, 0], sizes = [2, 32], strides = [1, 1]} : vector<16x32xf32> to vector<2x32xf32>
    %cst_14 = arith.constant dense<0.000000e+00> : vector<2x32xf32>
    %33 = tpu.matmul %31, %2, %cst_14 {dimension_numbers = #tpu.dot_dimension_numbers<[1], [1], [0], [0], [0, 0, 1, 0], [], []>} : vector<2x32xf32>, vector<32x32xf32>, vector<2x32xf32> -> vector<2x32xf32>
    %34 = arith.addf %32, %33 : vector<2x32xf32>
    %35 = math.tanh %34 : vector<2x32xf32>
    %36 = vector.extract_strided_slice %6 {offsets = [14, 0], sizes = [2, 32], strides = [1, 1]} : vector<16x32xf32> to vector<2x32xf32>
    %cst_15 = arith.constant dense<0.000000e+00> : vector<2x32xf32>
    %37 = tpu.matmul %35, %2, %cst_15 {dimension_numbers = #tpu.dot_dimension_numbers<[1], [1], [0], [0], [0, 0, 1, 0], [], []>} : vector<2x32xf32>, vector<32x32xf32>, vector<2x32xf32> -> vector<2x32xf32>
    %38 = arith.addf %36, %37 : vector<2x32xf32>
    %39 = math.tanh %38 : vector<2x32xf32>
    %40 = tpu.concatenate %11, %15, %19, %23, %27, %31, %35, %39 in 0 : vector<2x32xf32>, vector<2x32xf32>, vector<2x32xf32>, vector<2x32xf32>, vector<2x32xf32>, vector<2x32xf32>, vector<2x32xf32>, vector<2x32xf32> -> vector<16x32xf32>
    %c64 = arith.constant 64 : index
    %c0_16 = arith.constant 0 : index
    %41 = vector.load %arg2[%c64, %c0_16] : memref<96x32xf32, #tpu.memory_space<vmem>>, vector<32x32xf32>
    %c32 = arith.constant 32 : index
    %c0_17 = arith.constant 0 : index
    %42 = vector.load %arg2[%c32, %c0_17] : memref<96x32xf32, #tpu.memory_space<vmem>>, vector<32x32xf32>
    %cst_18 = arith.constant dense<0.000000e+00> : vector<16x32xf32>
    %43 = tpu.matmul %40, %41, %cst_18 {dimension_numbers = #tpu.dot_dimension_numbers<[1], [1], [0], [0], [0, 0, 1, 0], [], []>} : vector<16x32xf32>, vector<32x32xf32>, vector<16x32xf32> -> vector<16x32xf32>
    %c1 = arith.constant 1 : index
    %c0_19 = arith.constant 0 : index
    %44 = vector.load %arg8[%c1, %c0_19] : memref<12x736xf32, #tpu.memory_space<vmem>>, vector<1x32xf32>
    %45 = vector.broadcast %44 : vector<1x32xf32> to vector<16x32xf32>
    %46 = arith.addf %43, %45 : vector<16x32xf32>
    %cst_20 = arith.constant 0.000000e+00 : f32
    %47 = vector.broadcast %cst_20 : f32 to vector<2x32xf32>
    %48 = vector.extract_strided_slice %46 {offsets = [0, 0], sizes = [2, 32], strides = [1, 1]} : vector<16x32xf32> to vector<2x32xf32>
    %cst_21 = arith.constant dense<0.000000e+00> : vector<2x32xf32>
    %49 = tpu.matmul %47, %42, %cst_21 {dimension_numbers = #tpu.dot_dimension_numbers<[1], [1], [0], [0], [0, 0, 1, 0], [], []>} : vector<2x32xf32>, vector<32x32xf32>, vector<2x32xf32> -> vector<2x32xf32>
    %50 = arith.addf %48, %49 : vector<2x32xf32>
    %51 = math.tanh %50 : vector<2x32xf32>
    %52 = vector.extract_strided_slice %46 {offsets = [2, 0], sizes = [2, 32], strides = [1, 1]} : vector<16x32xf32> to vector<2x32xf32>
    %cst_22 = arith.constant dense<0.000000e+00> : vector<2x32xf32>
    %53 = tpu.matmul %51, %42, %cst_22 {dimension_numbers = #tpu.dot_dimension_numbers<[1], [1], [0], [0], [0, 0, 1, 0], [], []>} : vector<2x32xf32>, vector<32x32xf32>, vector<2x32xf32> -> vector<2x32xf32>
    %54 = arith.addf %52, %53 : vector<2x32xf32>
    %55 = math.tanh %54 : vector<2x32xf32>
    %56 = vector.extract_strided_slice %46 {offsets = [4, 0], sizes = [2, 32], strides = [1, 1]} : vector<16x32xf32> to vector<2x32xf32>
    %cst_23 = arith.constant dense<0.000000e+00> : vector<2x32xf32>
    %57 = tpu.matmul %55, %42, %cst_23 {dimension_numbers = #tpu.dot_dimension_numbers<[1], [1], [0], [0], [0, 0, 1, 0], [], []>} : vector<2x32xf32>, vector<32x32xf32>, vector<2x32xf32> -> vector<2x32xf32>
    %58 = arith.addf %56, %57 : vector<2x32xf32>
    %59 = math.tanh %58 : vector<2x32xf32>
    %60 = vector.extract_strided_slice %46 {offsets = [6, 0], sizes = [2, 32], strides = [1, 1]} : vector<16x32xf32> to vector<2x32xf32>
    %cst_24 = arith.constant dense<0.000000e+00> : vector<2x32xf32>
    %61 = tpu.matmul %59, %42, %cst_24 {dimension_numbers = #tpu.dot_dimension_numbers<[1], [1], [0], [0], [0, 0, 1, 0], [], []>} : vector<2x32xf32>, vector<32x32xf32>, vector<2x32xf32> -> vector<2x32xf32>
    %62 = arith.addf %60, %61 : vector<2x32xf32>
    %63 = math.tanh %62 : vector<2x32xf32>
    %64 = vector.extract_strided_slice %46 {offsets = [8, 0], sizes = [2, 32], strides = [1, 1]} : vector<16x32xf32> to vector<2x32xf32>
    %cst_25 = arith.constant dense<0.000000e+00> : vector<2x32xf32>
    %65 = tpu.matmul %63, %42, %cst_25 {dimension_numbers = #tpu.dot_dimension_numbers<[1], [1], [0], [0], [0, 0, 1, 0], [], []>} : vector<2x32xf32>, vector<32x32xf32>, vector<2x32xf32> -> vector<2x32xf32>
    %66 = arith.addf %64, %65 : vector<2x32xf32>
    %67 = math.tanh %66 : vector<2x32xf32>
    %68 = vector.extract_strided_slice %46 {offsets = [10, 0], sizes = [2, 32], strides = [1, 1]} : vector<16x32xf32> to vector<2x32xf32>
    %cst_26 = arith.constant dense<0.000000e+00> : vector<2x32xf32>
    %69 = tpu.matmul %67, %42, %cst_26 {dimension_numbers = #tpu.dot_dimension_numbers<[1], [1], [0], [0], [0, 0, 1, 0], [], []>} : vector<2x32xf32>, vector<32x32xf32>, vector<2x32xf32> -> vector<2x32xf32>
    %70 = arith.addf %68, %69 : vector<2x32xf32>
    %71 = math.tanh %70 : vector<2x32xf32>
    %72 = vector.extract_strided_slice %46 {offsets = [12, 0], sizes = [2, 32], strides = [1, 1]} : vector<16x32xf32> to vector<2x32xf32>
    %cst_27 = arith.constant dense<0.000000e+00> : vector<2x32xf32>
    %73 = tpu.matmul %71, %42, %cst_27 {dimension_numbers = #tpu.dot_dimension_numbers<[1], [1], [0], [0], [0, 0, 1, 0], [], []>} : vector<2x32xf32>, vector<32x32xf32>, vector<2x32xf32> -> vector<2x32xf32>
    %74 = arith.addf %72, %73 : vector<2x32xf32>
    %75 = math.tanh %74 : vector<2x32xf32>
    %76 = vector.extract_strided_slice %46 {offsets = [14, 0], sizes = [2, 32], strides = [1, 1]} : vector<16x32xf32> to vector<2x32xf32>
    %cst_28 = arith.constant dense<0.000000e+00> : vector<2x32xf32>
    %77 = tpu.matmul %75, %42, %cst_28 {dimension_numbers = #tpu.dot_dimension_numbers<[1], [1], [0], [0], [0, 0, 1, 0], [], []>} : vector<2x32xf32>, vector<32x32xf32>, vector<2x32xf32> -> vector<2x32xf32>
    %78 = arith.addf %76, %77 : vector<2x32xf32>
    %79 = math.tanh %78 : vector<2x32xf32>
    %80 = tpu.concatenate %51, %55, %59, %63, %67, %71, %75, %79 in 0 : vector<2x32xf32>, vector<2x32xf32>, vector<2x32xf32>, vector<2x32xf32>, vector<2x32xf32>, vector<2x32xf32>, vector<2x32xf32>, vector<2x32xf32> -> vector<16x32xf32>
    %c0_29 = arith.constant 0 : index
    %c0_30 = arith.constant 0 : index
    %81 = vector.load %arg3[%c0_29, %c0_30] : memref<736x32xf32, #tpu.memory_space<vmem>>, vector<736x32xf32>
    %cst_31 = arith.constant dense<0.000000e+00> : vector<16x736xf32>
    %82 = tpu.matmul %80, %81, %cst_31 {dimension_numbers = #tpu.dot_dimension_numbers<[1], [1], [0], [0], [0, 0, 1, 0], [], []>} : vector<16x32xf32>, vector<736x32xf32>, vector<16x736xf32> -> vector<16x736xf32>
    %c2 = arith.constant 2 : index
    %c0_32 = arith.constant 0 : index
    %83 = vector.load %arg8[%c2, %c0_32] : memref<12x736xf32, #tpu.memory_space<vmem>>, vector<1x736xf32>
    %84 = vector.broadcast %83 : vector<1x736xf32> to vector<16x736xf32>
    %85 = arith.addf %82, %84 : vector<16x736xf32>
    %86 = vector.extract_strided_slice %85 {offsets = [0, 0], sizes = [16, 288], strides = [1, 1]} : vector<16x736xf32> to vector<16x288xf32>
    %cst_33 = arith.constant 0.000000e+00 : f32
    %87 = vector.broadcast %cst_33 : f32 to vector<16x288xf32>
    %88 = arith.maximumf %86, %87 : vector<16x288xf32>
    %89 = vector.extract_strided_slice %85 {offsets = [0, 288], sizes = [16, 288], strides = [1, 1]} : vector<16x736xf32> to vector<16x288xf32>
    %cst_34 = arith.constant 0.000000e+00 : f32
    %90 = vector.broadcast %cst_34 : f32 to vector<16x288xf32>
    %91 = arith.maximumf %89, %90 : vector<16x288xf32>
    %92 = vector.extract_strided_slice %85 {offsets = [0, 576], sizes = [16, 160], strides = [1, 1]} : vector<16x736xf32> to vector<16x160xf32>
    %c0_35 = arith.constant 0 : index
    %c0_36 = arith.constant 0 : index
    %93 = vector.load %arg4[%c0_35, %c0_36] : memref<8x288xf32, #tpu.memory_space<vmem>>, vector<8x288xf32>
    %94 = vector.extract_strided_slice %93 {offsets = [0, 0], sizes = [4, 288], strides = [1, 1]} : vector<8x288xf32> to vector<4x288xf32>
    %cst_37 = arith.constant dense<0.000000e+00> : vector<16x4xf32>
    %95 = tpu.matmul %88, %94, %cst_37 {dimension_numbers = #tpu.dot_dimension_numbers<[1], [1], [0], [0], [0, 0, 1, 0], [], []>} : vector<16x288xf32>, vector<4x288xf32>, vector<16x4xf32> -> vector<16x4xf32>
    %c3 = arith.constant 3 : index
    %c0_38 = arith.constant 0 : index
    %96 = vector.load %arg8[%c3, %c0_38] : memref<12x736xf32, #tpu.memory_space<vmem>>, vector<1x4xf32>
    %97 = vector.broadcast %96 : vector<1x4xf32> to vector<16x4xf32>
    %98 = arith.addf %95, %97 : vector<16x4xf32>
    %99 = vector.extract_strided_slice %93 {offsets = [4, 0], sizes = [4, 288], strides = [1, 1]} : vector<8x288xf32> to vector<4x288xf32>
    %cst_39 = arith.constant dense<0.000000e+00> : vector<16x4xf32>
    %100 = tpu.matmul %91, %99, %cst_39 {dimension_numbers = #tpu.dot_dimension_numbers<[1], [1], [0], [0], [0, 0, 1, 0], [], []>} : vector<16x288xf32>, vector<4x288xf32>, vector<16x4xf32> -> vector<16x4xf32>
    %c4 = arith.constant 4 : index
    %c0_40 = arith.constant 0 : index
    %101 = vector.load %arg8[%c4, %c0_40] : memref<12x736xf32, #tpu.memory_space<vmem>>, vector<1x4xf32>
    %102 = vector.broadcast %101 : vector<1x4xf32> to vector<16x4xf32>
    %103 = arith.addf %100, %102 : vector<16x4xf32>
    %c5 = arith.constant 5 : index
    %c0_41 = arith.constant 0 : index
    %104 = vector.load %arg8[%c5, %c0_41] : memref<12x736xf32, #tpu.memory_space<vmem>>, vector<1x160xf32>
    %c6 = arith.constant 6 : index
    %c0_42 = arith.constant 0 : index
    %105 = vector.load %arg8[%c6, %c0_42] : memref<12x736xf32, #tpu.memory_space<vmem>>, vector<1x160xf32>
    %cst_43 = arith.constant dense<0.000000e+00> : vector<160xf32>
    %106 = vector.multi_reduction <add>, %92, %cst_43 [0] : vector<16x160xf32> to vector<160xf32>
    %107 = vector.shape_cast %106 : vector<160xf32> to vector<1x160xf32>
    %cst_44 = arith.constant 1.600000e+01 : f32
    %108 = vector.broadcast %cst_44 : f32 to vector<1x160xf32>
    %109 = arith.divf %107, %108 : vector<1x160xf32>
    %110 = vector.broadcast %109 : vector<1x160xf32> to vector<16x160xf32>
    %111 = arith.subf %92, %110 : vector<16x160xf32>
    %112 = arith.mulf %111, %111 : vector<16x160xf32>
    %cst_45 = arith.constant dense<0.000000e+00> : vector<160xf32>
    %113 = vector.multi_reduction <add>, %112, %cst_45 [0] : vector<16x160xf32> to vector<160xf32>
    %114 = vector.shape_cast %113 : vector<160xf32> to vector<1x160xf32>
    %cst_46 = arith.constant 1.600000e+01 : f32
    %115 = vector.broadcast %cst_46 : f32 to vector<1x160xf32>
    %116 = arith.divf %114, %115 : vector<1x160xf32>
    %117 = vector.broadcast %109 : vector<1x160xf32> to vector<16x160xf32>
    %118 = arith.subf %92, %117 : vector<16x160xf32>
    %cst_47 = arith.constant 9.99999974E-6 : f32
    %119 = vector.broadcast %cst_47 : f32 to vector<1x160xf32>
    %120 = arith.addf %116, %119 : vector<1x160xf32>
    %121 = math.rsqrt %120 : vector<1x160xf32>
    %122 = vector.broadcast %121 : vector<1x160xf32> to vector<16x160xf32>
    %123 = arith.mulf %118, %122 : vector<16x160xf32>
    %124 = vector.broadcast %104 : vector<1x160xf32> to vector<16x160xf32>
    %125 = arith.mulf %123, %124 : vector<16x160xf32>
    %126 = vector.broadcast %105 : vector<1x160xf32> to vector<16x160xf32>
    %127 = arith.addf %125, %126 : vector<16x160xf32>
    %cst_48 = arith.constant 0.000000e+00 : f32
    %128 = vector.broadcast %cst_48 : f32 to vector<16x160xf32>
    %129 = arith.maximumf %127, %128 : vector<16x160xf32>
    %c0_49 = arith.constant 0 : index
    %c0_50 = arith.constant 0 : index
    %130 = vector.load %arg5[%c0_49, %c0_50] : memref<80x160xf32, #tpu.memory_space<vmem>>, vector<80x160xf32>
    %cst_51 = arith.constant dense<0.000000e+00> : vector<16x80xf32>
    %131 = tpu.matmul %129, %130, %cst_51 {dimension_numbers = #tpu.dot_dimension_numbers<[1], [1], [0], [0], [0, 0, 1, 0], [], []>} : vector<16x160xf32>, vector<80x160xf32>, vector<16x80xf32> -> vector<16x80xf32>
    %c7 = arith.constant 7 : index
    %c0_52 = arith.constant 0 : index
    %132 = vector.load %arg8[%c7, %c0_52] : memref<12x736xf32, #tpu.memory_space<vmem>>, vector<1x80xf32>
    %133 = vector.broadcast %132 : vector<1x80xf32> to vector<16x80xf32>
    %134 = arith.addf %131, %133 : vector<16x80xf32>
    %c8 = arith.constant 8 : index
    %c0_53 = arith.constant 0 : index
    %135 = vector.load %arg8[%c8, %c0_53] : memref<12x736xf32, #tpu.memory_space<vmem>>, vector<1x80xf32>
    %c9 = arith.constant 9 : index
    %c0_54 = arith.constant 0 : index
    %136 = vector.load %arg8[%c9, %c0_54] : memref<12x736xf32, #tpu.memory_space<vmem>>, vector<1x80xf32>
    %cst_55 = arith.constant dense<0.000000e+00> : vector<80xf32>
    %137 = vector.multi_reduction <add>, %134, %cst_55 [0] : vector<16x80xf32> to vector<80xf32>
    %138 = vector.shape_cast %137 : vector<80xf32> to vector<1x80xf32>
    %cst_56 = arith.constant 1.600000e+01 : f32
    %139 = vector.broadcast %cst_56 : f32 to vector<1x80xf32>
    %140 = arith.divf %138, %139 : vector<1x80xf32>
    %141 = vector.broadcast %140 : vector<1x80xf32> to vector<16x80xf32>
    %142 = arith.subf %134, %141 : vector<16x80xf32>
    %143 = arith.mulf %142, %142 : vector<16x80xf32>
    %cst_57 = arith.constant dense<0.000000e+00> : vector<80xf32>
    %144 = vector.multi_reduction <add>, %143, %cst_57 [0] : vector<16x80xf32> to vector<80xf32>
    %145 = vector.shape_cast %144 : vector<80xf32> to vector<1x80xf32>
    %cst_58 = arith.constant 1.600000e+01 : f32
    %146 = vector.broadcast %cst_58 : f32 to vector<1x80xf32>
    %147 = arith.divf %145, %146 : vector<1x80xf32>
    %148 = vector.broadcast %140 : vector<1x80xf32> to vector<16x80xf32>
    %149 = arith.subf %134, %148 : vector<16x80xf32>
    %cst_59 = arith.constant 9.99999974E-6 : f32
    %150 = vector.broadcast %cst_59 : f32 to vector<1x80xf32>
    %151 = arith.addf %147, %150 : vector<1x80xf32>
    %152 = math.rsqrt %151 : vector<1x80xf32>
    %153 = vector.broadcast %152 : vector<1x80xf32> to vector<16x80xf32>
    %154 = arith.mulf %149, %153 : vector<16x80xf32>
    %155 = vector.broadcast %135 : vector<1x80xf32> to vector<16x80xf32>
    %156 = arith.mulf %154, %155 : vector<16x80xf32>
    %157 = vector.broadcast %136 : vector<1x80xf32> to vector<16x80xf32>
    %158 = arith.addf %156, %157 : vector<16x80xf32>
    %cst_60 = arith.constant 0.000000e+00 : f32
    %159 = vector.broadcast %cst_60 : f32 to vector<16x80xf32>
    %160 = arith.maximumf %158, %159 : vector<16x80xf32>
    %c0_61 = arith.constant 0 : index
    %c0_62 = arith.constant 0 : index
    %161 = vector.load %arg6[%c0_61, %c0_62] : memref<30x80xf32, #tpu.memory_space<vmem>>, vector<30x80xf32>
    %cst_63 = arith.constant dense<0.000000e+00> : vector<16x30xf32>
    %162 = tpu.matmul %160, %161, %cst_63 {dimension_numbers = #tpu.dot_dimension_numbers<[1], [1], [0], [0], [0, 0, 1, 0], [], []>} : vector<16x80xf32>, vector<30x80xf32>, vector<16x30xf32> -> vector<16x30xf32>
    %c10 = arith.constant 10 : index
    %c0_64 = arith.constant 0 : index
    %163 = vector.load %arg8[%c10, %c0_64] : memref<12x736xf32, #tpu.memory_space<vmem>>, vector<1x30xf32>
    %164 = vector.broadcast %163 : vector<1x30xf32> to vector<16x30xf32>
    %165 = arith.addf %162, %164 : vector<16x30xf32>
    %c0_65 = arith.constant 0 : index
    %c0_66 = arith.constant 0 : index
    %166 = vector.load %arg7[%c0_65, %c0_66] : memref<7x30xf32, #tpu.memory_space<vmem>>, vector<7x30xf32>
    %cst_67 = arith.constant dense<0.000000e+00> : vector<16x7xf32>
    %167 = tpu.matmul %165, %166, %cst_67 {dimension_numbers = #tpu.dot_dimension_numbers<[1], [1], [0], [0], [0, 0, 1, 0], [], []>} : vector<16x30xf32>, vector<7x30xf32>, vector<16x7xf32> -> vector<16x7xf32>
    %c11 = arith.constant 11 : index
    %c0_68 = arith.constant 0 : index
    %168 = vector.load %arg8[%c11, %c0_68] : memref<12x736xf32, #tpu.memory_space<vmem>>, vector<1x7xf32>
    %169 = vector.broadcast %168 : vector<1x7xf32> to vector<16x7xf32>
    %170 = arith.addf %167, %169 : vector<16x7xf32>
    %171 = tpu.concatenate %98, %103, %170 in 1 : vector<16x4xf32>, vector<16x4xf32>, vector<16x7xf32> -> vector<16x15xf32>
    %c0_69 = arith.constant 0 : index
    %c0_70 = arith.constant 0 : index
    %172 = vector.load %arg9[%c0_69, %c0_70] : memref<16x15xf32, #tpu.memory_space<vmem>>, vector<16x15xf32>
    tpu.vector_store %arg9[%c0_69, %c0_70], %171 {strides = array<i32>} : memref<16x15xf32, #tpu.memory_space<vmem>>, vector<16x15xf32>,
    return
  }
}

</mosaic_0001>

<bundles_post_ra>
// kernel: forward.1
= control target key start
LH: loop header
LB: loop body
LE: loop exit
PB: predicated region body
PF: predicated region fallthrough
CT: control target
= control target key end

     0   :  { %14 = vsyncpa [#allocation3], 0  ;;  %s4644_s0 = inlined_call_operand.vmem [shape: f32[16,15], index: 0, kind: input, shape index: {}]   ;;  %s4645_s1 = inlined_call_operand.hbm [shape: f32[32,15], index: 1, kind: input, shape index: {}]   ;;  %s4646_s2 = inlined_call_operand.hbm [shape: f32[96,32], index: 2, kind: input, shape index: {}]   ;;  %s4647_s3 = inlined_call_operand.hbm [shape: f32[736,32], index: 3, kind: input, shape index: {}]   ;;  %s4648_s4 = inlined_call_operand.hbm [shape: f32[8,288], index: 4, kind: input, shape index: {}]   ;;  %s4649_s5 = inlined_call_operand.vmem [shape: f32[80,160], index: 5, kind: input, shape index: {}]   ;;  %s4650_s6 = inlined_call_operand.hbm [shape: f32[30,80], index: 6, kind: input, shape index: {}]   ;;  %s4651_s7 = inlined_call_operand.vmem [shape: f32[7,30], index: 7, kind: input, shape index: {}]   ;;  %s4652_s8 = inlined_call_operand.hbm [shape: f32[12,736], index: 8, kind: input, shape index: {}]   ;;  %s4653_s9 = inlined_call_operand.vmem [shape: f32[16,15], index: 9, kind: output, shape index: {}]  }
   0x1   :  { %15 = vsyncpa [#allocation5], 0 }
   0x2   :  { %16 = vsyncpa [#allocation8], 0 }
   0x3   :  { %17 = vsyncpa [#allocation11], 0  ;;  %s3920_s30 = smov [#allocation4]   ;;  %s3921_s11 = smov [#allocation7]  }
   0x4   :  { %s37_s10 = sshll.u32 %s3920_s30, 4  ;;  %s62_s12 = sshll.u32 %s3921_s11, 4  ;;  %s38_s10 = int_to_ptr.vmem [resolvable:$true] %s37_s10  ;;  %s63_s12 = int_to_ptr.vmem [resolvable:$true] %s62_s12 }
   0x5   :  { %s3800_s13 = scalar_lea.vmem %s38_s10, 1536  ;;  %p3805_p1 = scmp.lt.s32.totalorder %s38_s10, %s38_s10 }
   0x6   :  { %p3801_p0 = scmp.ne.s32.totalorder %s38_s10, %s3800_s13  ;;  %p3806_p2 = scmp.lt.s32.totalorder %s3800_s13, %s3800_s13 }
   0x8   :  { %p3807_p3 = por %p3806_p2, %p3805_p1 }
   0xa   :  { %p3808_p4 = pnand %p3807_p3, %p3801_p0 }
   0xc   :  { %3811 = shalt.err (!%p3808_p4)
}
   0xd   :  { %s3922_s14 = smov 128   ;;  %s3923_s15 = smov 8  }
   0xe   :  { %43 = dma.hbm_to_vmem [thread:$0]  %s4646_s2, 1536, %s38_s10, [#allocation5], %s3922_s14, %s3922_s14, %s3923_s15  }
   0xf   :  { %s3820_s18 = scalar_lea.vmem %s63_s12, 384  ;;  %p3825_p6 = scmp.lt.s32.totalorder %s63_s12, %s63_s12 }
  0x10   :  { %p3821_p5 = scmp.ne.s32.totalorder %s63_s12, %s3820_s18  ;;  %p3826_p7 = scmp.lt.s32.totalorder %s3820_s18, %s3820_s18 }
  0x12   :  { %p3827_p8 = por %p3826_p7, %p3825_p6 }
  0x14   :  { %p3828_p9 = pnand %p3827_p8, %p3821_p5 }
  0x16   :  { %3831 = shalt.err (!%p3828_p9)
}
  0x17   :  { %65 = dma.hbm_to_vmem [thread:$0]  %s4648_s4, 384, %s63_s12, [#allocation8]  }
  0x18   :  { %s3924_s21 = smov [#allocation2]   ;;  %s3925_s23 = smov [#allocation6]  }
  0x19   :  { %s25_s22 = sshll.u32 %s3924_s21, 4  ;;  %s49_s24 = sshll.u32 %s3925_s23, 4  ;;  %s26_s22 = int_to_ptr.vmem [resolvable:$true] %s25_s22  ;;  %s50_s24 = int_to_ptr.vmem [resolvable:$true] %s49_s24 }
  0x1a   :  { %s3840_s25 = scalar_lea.vmem %s26_s22, 512  ;;  %p3845_p11 = scmp.lt.s32.totalorder %s26_s22, %s26_s22 }
  0x1b   :  { %p3841_p10 = scmp.ne.s32.totalorder %s26_s22, %s3840_s25  ;;  %p3846_p12 = scmp.lt.s32.totalorder %s3840_s25, %s3840_s25 }
  0x1d   :  { %p3847_p13 = por %p3846_p12, %p3845_p11 }
  0x1f   :  { %p3848_p0 = pnand %p3847_p13, %p3841_p10 }
  0x21   :  { %3851 = shalt.err (!%p3848_p0)
}
  0x22   :  { %31 = dma.hbm_to_vmem [thread:$0]  %s4645_s1, 512, %s26_s22, [#allocation3], %s3922_s14, %s3922_s14, %s3923_s15  }
  0x23   :  { %s3860_s4 = scalar_lea.vmem %s50_s24, 11776  ;;  %p3865_p2 = scmp.lt.s32.totalorder %s50_s24, %s50_s24 }
  0x24   :  { %p3861_p1 = scmp.ne.s32.totalorder %s50_s24, %s3860_s4  ;;  %p3866_p3 = scmp.lt.s32.totalorder %s3860_s4, %s3860_s4 }
  0x26   :  { %p3867_p4 = por %p3866_p3, %p3865_p2 }
  0x28   :  { %p3868_p5 = pnand %p3867_p4, %p3861_p1 }
  0x2a   :  { %3871 = shalt.err (!%p3868_p5)
}
  0x2b   :  { %55 = dma.hbm_to_vmem [thread:$0]  %s4647_s3, 11776, %s50_s24, [#allocation5], %s3922_s14, %s3922_s14, %s3923_s15  }
  0x2c   :  { %s3926_s29 = smov [#allocation9]   ;;  %s3927_s10 = smov [#allocation10]  }
  0x2d   :  { %s73_s30 = sshll.u32 %s3926_s29, 4  ;;  %s87_s11 = sshll.u32 %s3927_s10, 4  ;;  %s74_s30 = int_to_ptr.vmem [resolvable:$true] %s73_s30  ;;  %s88_s11 = int_to_ptr.vmem [resolvable:$true] %s87_s11 }
  0x2e   :  { %s3880_s1 = scalar_lea.vmem %s74_s30, 512  ;;  %p3885_p7 = scmp.lt.s32.totalorder %s74_s30, %s74_s30 }
  0x2f   :  { %p3881_p6 = scmp.ne.s32.totalorder %s74_s30, %s3880_s1  ;;  %p3886_p8 = scmp.lt.s32.totalorder %s3880_s1, %s3880_s1 }
  0x31   :  { %p3887_p9 = por %p3886_p8, %p3885_p7 }
  0x33   :  { %p3888_p10 = pnand %p3887_p9, %p3881_p6 }
  0x35   :  { %3891 = shalt.err (!%p3888_p10)
}
  0x36   :  { %79 = dma.hbm_to_vmem [thread:$0]  %s4650_s6, 512, %s74_s30, [#allocation8], %s3922_s14, %s3922_s14, %s3923_s15  }
  0x37   :  { %s3900_s3 = scalar_lea.vmem %s88_s11, 1536  ;;  %p3905_p12 = scmp.lt.s32.totalorder %s88_s11, %s88_s11 }
  0x38   :  { %p3901_p11 = scmp.ne.s32.totalorder %s88_s11, %s3900_s3  ;;  %p3906_p13 = scmp.lt.s32.totalorder %s3900_s3, %s3900_s3 }
  0x3a   :  { %p3907_p0 = por %p3906_p13, %p3905_p12 }
  0x3c   :  { %p3908_p1 = pnand %p3907_p0, %p3901_p11 }
  0x3e   :  { %3911 = shalt.err (!%p3908_p1)
}
  0x3f   :  { %s3928_s16 = smov 768   ;;  %s3929_s17 = smov 48  }
  0x40   :  { %93 = dma.hbm_to_vmem [thread:$0]  %s4652_s8, 1536, %s88_s11, [#allocation11], %s3928_s16, %s3928_s16, %s3929_s17  }
  0x41   :  { %3912 = dma.done.wait [#allocation3], 512  }
  0x42   :  { %3913 = vsyncadd [#allocation3], 4294966784 }
  0x43   :  { %3914 = dma.done.wait [#allocation5], 13312  }
  0x44   :  { %3915 = vsyncadd [#allocation5], 4294953984 }
  0x45   :  { %3916 = dma.done.wait [#allocation8], 896  }
  0x46   :  { %3917 = vsyncadd [#allocation8], 4294966400 }
  0x47   :  { %3918 = dma.done.wait [#allocation11], 1536  }
  0x48   :  { %3919 = vsyncadd [#allocation11], 4294965760  ;;  %v3930_v0 = vmov 0.0   ;;  %vm3931_vm0 = vmmov 0   ;;  %vm123_vm1 = vcmask 121856   ;;  %v117_v1 = vld [vmem:[#allocation2 + $0x18] sm:$0xff] }
  0x49   :  { %3527 = vmatprep.subr.mxu0 %v3930_v0  ;;  %3535 = vmatprep.mubr.msk.f32.mxu0 %vm3931_vm0, %v3930_v0  ;;  %v116_v2 = vld [vmem:[#allocation2 + $0x10] sm:$0xff]  ;;  %v112_v3 = vld [vmem:[%s4644_s0] sm:$0xff]  ;;  %v4024_v4 = vld [vmem:[#allocation4 + $0x18] sm:$0xff]  ;;  %vm217_vm2 = vcmask 261120   ;;  %vm853_vm3 = vcmask 1041408   ;;  %vm855_vm4 = vcmask 1043456  }
  0x4a   :  { %3505 = vmatprep.subr.msk.mxu1 %vm123_vm1, %v117_v1  ;;  %3513 = vmatprep.mubr.msk.f32.mxu1 %vm123_vm1, %v112_v3  ;;  %v115_v5 = vld [vmem:[#allocation2 + $0x8] sm:$0xff]  ;;  %v4031_v6 = vld [vmem:[#allocation4 + $0x10] sm:$0xff]  ;;  %v114_v7 = vld [vmem:[#allocation2] sm:$0xff]  ;;  %vm857_vm5 = vcmask 1045504   ;;  %s3933_s21 = smov 96   ;;  %vm2608_vm6 = vcmask 1048064  }
  0x4b   :  { %3506 = vmatpush3.xpose.msk.msra.mxu1 %vm123_vm1, %v117_v1  ;;  %3528 = vmatpush3.xpose.msk.msra.mxu0 %vm217_vm2, %v4024_v4  ;;  %v4038_v8 = vld [vmem:[#allocation4 + $0x8] sm:$0xff]  ;;  %v4048_v10 = vld [vmem:[#allocation4] sm:$0xff]  ;;  %v122_v11 = vld [vmem:[#allocation10] ss:$0 sm:$0xff]  ;;  %vm2432_vm7 = vcmask 785408   ;;  %vm2679_vm8 = vcmask 523264  }
  0x4c   :  { %3507 = vmatprep.subr.msk.mxu1 %vm123_vm1, %v116_v2  ;;  %3529 = vmatprep.subr.mxu0 %v3930_v0  ;;  %v113_v9 = vld [vmem:[%s4644_s0 + $0x8] sm:$0xff]  ;;  %v865_v59 = vld [vmem:[#allocation4 + $0x58] sm:$0xff]  ;;  %v864_v61 = vld [vmem:[#allocation4 + $0x50] sm:$0xff]  ;;  %s3932_s0 = smov 64   ;;  %vm2859_vm9 = vcmask 654336   ;;  %vm2994_vm10 = vcmask 244736  }
  0x4d   :  { %v4175_v60 = vld [vmem:[#allocation4 + $0x38] sm:$0xff]  ;;  %v4181_v62 = vld [vmem:[#allocation4 + $0x30] sm:$0xff]  ;;  %v863_v63 = vld [vmem:[#allocation4 + $0x48] sm:$0xff]  ;;  %vm3095_vm11 = vcmask 31744   ;;  %vm3098_vm12 = vcmask 64512  }
  0x4e   :  { %v4188_v1 = vld [vmem:[#allocation4 + $0x28] sm:$0xff]  ;;  %v4195_v3 = vld [vmem:[#allocation4 + $0x20] sm:$0xff] }
  0x4f   :  { %3508 = vmatpush3.xpose.msk.msra.mxu1 %vm123_vm1, %v116_v2  ;;  %3530 = vmatpush3.xpose.msk.msra.mxu0 %vm217_vm2, %v4031_v6  ;;  %v862_v2 = vld [vmem:[#allocation4 + $0x40] sm:$0xff] }
  0x50   :  { %3509 = vmatprep.subr.msk.mxu1 %vm123_vm1, %v115_v5  ;;  %3531 = vmatprep.subr.mxu0 %v3930_v0 }
  0x53   :  { %3510 = vmatpush3.xpose.msk.msra.mxu1 %vm123_vm1, %v115_v5  ;;  %3532 = vmatpush3.xpose.msk.msra.mxu0 %vm217_vm2, %v4038_v8 }
  0x54   :  { %3511 = vmatprep.subr.msk.mxu1 %vm123_vm1, %v114_v7  ;;  %3533 = vmatprep.subr.mxu0 %v3930_v0 }
  0x57   :  { %3512 = vmatpush3.xpose.msk.msra.mxu1 %vm123_vm1, %v114_v7  ;;  %3534 = vmatpush3.xpose.msk.msra.mxu0 %vm217_vm2, %v4048_v10 }
  0x58   :  { %3516 = vmatprep.subr.mxu1 %v3930_v0  ;;  %3549 = vmatprep.subr.mxu0 %v3930_v0 }
  0x5a   :  { %3514 = vmatmul.mubr.msk.f32.vlgmr.msra.gmra.mxu1 %vm123_vm1, %v113_v9 }
  0x5b   :  { %3517 = vmatpush3.xpose.msk.msra.mxu1 %vm217_vm2, %v4024_v4  ;;  %3524 = vmatprep.mubr.msk.f32.mxu1 %vm3931_vm0, %v3930_v0 }
  0x5c   :  { %3518 = vmatprep.subr.mxu1 %v3930_v0 }
  0x5f   :  { %3519 = vmatpush3.xpose.msk.msra.mxu1 %vm217_vm2, %v4031_v6 }
  0x60   :  { %3520 = vmatprep.subr.mxu1 %v3930_v0 }
  0x63   :  { %3521 = vmatpush3.xpose.msk.msra.mxu1 %vm217_vm2, %v4038_v8 }
  0x64   :  { %3522 = vmatprep.subr.mxu1 %v3930_v0 }
  0x67   :  { %3523 = vmatpush3.xpose.msk.msra.mxu1 %vm217_vm2, %v4048_v10 }
  0x68   :  { %3538 = vmatprep.subr.mxu1 %v3930_v0 }
  0x6a   :  { %3525 = vmatmul.mubr.f32.vlgmr.msra.gmra.mxu1 %v3930_v0 }
  0x6b   :  { %3539 = vmatpush3.xpose.msk.msra.mxu1 %vm217_vm2, %v4024_v4  ;;  %3546 = vmatprep.mubr.msk.f32.mxu1 %vm3931_vm0, %v3930_v0 }
  0x6c   :  { %3540 = vmatprep.subr.mxu1 %v3930_v0 }
  0x6f   :  { %3541 = vmatpush3.xpose.msk.msra.mxu1 %vm217_vm2, %v4031_v6 }
  0x70   :  { %3542 = vmatprep.subr.mxu1 %v3930_v0 }
  0x73   :  { %3543 = vmatpush3.xpose.msk.msra.mxu1 %vm217_vm2, %v4038_v8 }
  0x74   :  { %3544 = vmatprep.subr.mxu1 %v3930_v0 }
  0x77   :  { %3545 = vmatpush3.xpose.msk.msra.mxu1 %vm217_vm2, %v4048_v10 }
  0x78   :  { %3560 = vmatprep.subr.mxu1 %v3930_v0 }
 0x11a   :  { %v3515_v12 = vpop.f32.mrf.mxu1 }
 0x11b   :  { %v4084_v13 = vadd.f32 %v3515_v12, %v122_v11  ;;  %v870_v12 = vld [vmem:[#allocation10 + $0x1] ss:$0 sm:$0xff] }
 0x11c   :  { %v208_v14 = vpop.f32.mrf.mxu1 }
 0x11d   :  { %v209_v15 = vadd.f32 %v208_v14, %v122_v11 }
 0x12a   :  { %v299_v16 = vpop.f32.mrf.mxu1 }
 0x12b   :  { %v303_v17 = vadd.f32 %v299_v16, %v209_v15 }
 0x12c   :  { %v3526_v18 = vpop.f32.mrf.mxu1 }
 0x12d   :  { %3754 = vtanh.f32 %v303_v17 }
 0x13a   :  { %v3755_v19 = vpop.eup %3754 }
 0x13b   :  { %3536 = vmatmul.mubr.msk.f32.vlgmr.msra.gmra.mxu0 %vm217_vm2, %v3755_v19 }
 0x13c   :  { %3550 = vmatpush3.xpose.msk.msra.mxu0 %vm217_vm2, %v4024_v4  ;;  %3557 = vmatprep.mubr.msk.f32.mxu0 %vm3931_vm0, %v3930_v0 }
 0x13d   :  { %3551 = vmatprep.subr.mxu0 %v3930_v0 }
 0x140   :  { %3552 = vmatpush3.xpose.msk.msra.mxu0 %vm217_vm2, %v4031_v6 }
 0x141   :  { %3553 = vmatprep.subr.mxu0 %v3930_v0 }
 0x144   :  { %3554 = vmatpush3.xpose.msk.msra.mxu0 %vm217_vm2, %v4038_v8 }
 0x145   :  { %3555 = vmatprep.subr.mxu0 %v3930_v0 }
 0x148   :  { %3556 = vmatpush3.xpose.msk.msra.mxu0 %vm217_vm2, %v4048_v10 }
 0x149   :  { %3571 = vmatprep.subr.mxu0 %v3930_v0 }
 0x1fb   :  { %v374_v20 = vpop.f32.mrf.mxu0 }
 0x1fc   :  { %v379_v21 = vrot.slane %v374_v20, 6 }
 0x1fd   :  { %v3537_v22 = vpop.f32.mrf.mxu0 }
 0x1fe   :  { %v381_v23 = vadd.f32 %v379_v21, %v209_v15 }
 0x200   :  { %3756 = vtanh.f32 %v381_v23 }
 0x20d   :  { %v3757_v24 = vpop.eup %3756 }
 0x20e   :  { %v384_v25 = vrot.slane %v3757_v24, 2  ;;  %v854_v31 = vsel %vm853_vm3, %v3755_v19, %v3757_v24 }
 0x210   :  { %3547 = vmatmul.mubr.msk.f32.vlgmr.msra.gmra.mxu1 %vm217_vm2, %v384_v25 }
 0x211   :  { %3561 = vmatpush3.xpose.msk.msra.mxu1 %vm217_vm2, %v4024_v4  ;;  %3568 = vmatprep.mubr.msk.f32.mxu1 %vm3931_vm0, %v3930_v0 }
 0x212   :  { %3562 = vmatprep.subr.mxu1 %v3930_v0 }
 0x215   :  { %3563 = vmatpush3.xpose.msk.msra.mxu1 %vm217_vm2, %v4031_v6 }
 0x216   :  { %3564 = vmatprep.subr.mxu1 %v3930_v0 }
 0x219   :  { %3565 = vmatpush3.xpose.msk.msra.mxu1 %vm217_vm2, %v4038_v8 }
 0x21a   :  { %3566 = vmatprep.subr.mxu1 %v3930_v0 }
 0x21d   :  { %3567 = vmatpush3.xpose.msk.msra.mxu1 %vm217_vm2, %v4048_v10 }
 0x21e   :  { %3582 = vmatprep.subr.mxu1 %v3930_v0 }
 0x2d0   :  { %v453_v26 = vpop.f32.mrf.mxu1 }
 0x2d1   :  { %v458_v27 = vrot.slane %v453_v26, 4 }
 0x2d2   :  { %v3548_v28 = vpop.f32.mrf.mxu1 }
 0x2d3   :  { %v460_v29 = vadd.f32 %v458_v27, %v209_v15 }
 0x2d5   :  { %3758 = vtanh.f32 %v460_v29 }
 0x2e2   :  { %v3759_v30 = vpop.eup %3758 }
 0x2e3   :  { %v463_v32 = vrot.slane %v3759_v30, 4  ;;  %v856_v33 = vsel %vm855_vm4, %v854_v31, %v3759_v30 }
 0x2e5   :  { %3558 = vmatmul.mubr.msk.f32.vlgmr.msra.gmra.mxu0 %vm217_vm2, %v463_v32 }
 0x2e6   :  { %3572 = vmatpush3.xpose.msk.msra.mxu0 %vm217_vm2, %v4024_v4  ;;  %3579 = vmatprep.mubr.msk.f32.mxu0 %vm3931_vm0, %v3930_v0 }
 0x2e7   :  { %3573 = vmatprep.subr.mxu0 %v3930_v0 }
 0x2ea   :  { %3574 = vmatpush3.xpose.msk.msra.mxu0 %vm217_vm2, %v4031_v6 }
 0x2eb   :  { %3575 = vmatprep.subr.mxu0 %v3930_v0 }
 0x2ee   :  { %3576 = vmatpush3.xpose.msk.msra.mxu0 %vm217_vm2, %v4038_v8 }
 0x2ef   :  { %3577 = vmatprep.subr.mxu0 %v3930_v0 }
 0x2f2   :  { %3578 = vmatpush3.xpose.msk.msra.mxu0 %vm217_vm2, %v4048_v10 }
 0x2f3   :  { %3593 = vmatprep.subr.mxu0 %v3930_v0 }
 0x3a5   :  { %v532_v34 = vpop.f32.mrf.mxu0 }
 0x3a6   :  { %v537_v35 = vrot.slane %v532_v34, 2 }
 0x3a7   :  { %v3559_v36 = vpop.f32.mrf.mxu0 }
 0x3a8   :  { %v539_v37 = vadd.f32 %v537_v35, %v209_v15 }
 0x3aa   :  { %3760 = vtanh.f32 %v539_v37 }
 0x3b7   :  { %v3761_v38 = vpop.eup %3760 }
 0x3b8   :  { %v542_v39 = vrot.slane %v3761_v38, 6  ;;  %v858_v40 = vsel %vm857_vm5, %v856_v33, %v3761_v38 }
 0x3ba   :  { %3569 = vmatmul.mubr.msk.f32.vlgmr.msra.gmra.mxu1 %vm217_vm2, %v542_v39 }
 0x3bb   :  { %3583 = vmatpush3.xpose.msk.msra.mxu1 %vm217_vm2, %v4024_v4  ;;  %3590 = vmatprep.mubr.msk.f32.mxu1 %vm3931_vm0, %v3930_v0 }
 0x3bc   :  { %3584 = vmatprep.subr.mxu1 %v3930_v0 }
 0x3bf   :  { %3585 = vmatpush3.xpose.msk.msra.mxu1 %vm217_vm2, %v4031_v6 }
 0x3c0   :  { %3586 = vmatprep.subr.mxu1 %v3930_v0 }
 0x3c3   :  { %3587 = vmatpush3.xpose.msk.msra.mxu1 %vm217_vm2, %v4038_v8 }
 0x3c4   :  { %3588 = vmatprep.subr.mxu1 %v3930_v0 }
 0x3c7   :  { %3589 = vmatpush3.xpose.msk.msra.mxu1 %vm217_vm2, %v4048_v10 }
 0x3c8   :  { %3604 = vmatprep.subr.msk.mxu1 %vm217_vm2, %v865_v59 }
 0x47a   :  { %v611_v41 = vpop.f32.mrf.mxu1 }
 0x47b   :  { %v615_v42 = vadd.f32 %v611_v41, %v4084_v13 }
 0x47c   :  { %v3570_v43 = vpop.f32.mrf.mxu1 }
 0x47d   :  { %3762 = vtanh.f32 %v615_v42 }
 0x48a   :  { %v3763_v44 = vpop.eup %3762 }
 0x48b   :  { %3580 = vmatmul.mubr.msk.f32.vlgmr.msra.gmra.mxu0 %vm217_vm2, %v3763_v44 }
 0x48c   :  { %3594 = vmatpush3.xpose.msk.msra.mxu0 %vm217_vm2, %v4024_v4  ;;  %3601 = vmatprep.mubr.msk.f32.mxu0 %vm3931_vm0, %v3930_v0 }
 0x48d   :  { %3595 = vmatprep.subr.mxu0 %v3930_v0 }
 0x490   :  { %3596 = vmatpush3.xpose.msk.msra.mxu0 %vm217_vm2, %v4031_v6 }
 0x491   :  { %3597 = vmatprep.subr.mxu0 %v3930_v0 }
 0x494   :  { %3598 = vmatpush3.xpose.msk.msra.mxu0 %vm217_vm2, %v4038_v8 }
 0x495   :  { %3599 = vmatprep.subr.mxu0 %v3930_v0 }
 0x498   :  { %3600 = vmatpush3.xpose.msk.msra.mxu0 %vm217_vm2, %v4048_v10 }
 0x499   :  { %3615 = vmatprep.subr.mxu0 %v3930_v0 }
 0x54b   :  { %v686_v45 = vpop.f32.mrf.mxu0 }
 0x54c   :  { %v691_v46 = vrot.slane %v686_v45, 6 }
 0x54d   :  { %v3581_v47 = vpop.f32.mrf.mxu0 }
 0x54e   :  { %v693_v48 = vadd.f32 %v691_v46, %v4084_v13 }
 0x550   :  { %3764 = vtanh.f32 %v693_v48 }
 0x55d   :  { %v3765_v49 = vpop.eup %3764 }
 0x55e   :  { %v696_v50 = vrot.slane %v3765_v49, 2  ;;  %v859_v56 = vsel %vm853_vm3, %v3763_v44, %v3765_v49  ;;  %v1633_v44 = vld [vmem:[#allocation6 + $0xf8] sm:$0xff] }
 0x560   :  { %3591 = vmatmul.mubr.msk.f32.vlgmr.msra.gmra.mxu1 %vm217_vm2, %v696_v50 }
 0x561   :  { %3612 = vmatprep.mubr.msk.f32.mxu1 %vm217_vm2, %v858_v40  ;;  %3605 = vmatpush3.xpose.msk.msra.mxu1 %vm217_vm2, %v865_v59  ;;  %v1613_v59 = vld [vmem:[#allocation6 + $0x58] sm:$0xff] }
 0x562   :  { %3606 = vmatprep.subr.msk.mxu1 %vm217_vm2, %v864_v61 }
 0x565   :  { %3607 = vmatpush3.xpose.msk.msra.mxu1 %vm217_vm2, %v864_v61  ;;  %v1612_v61 = vld [vmem:[#allocation6 + $0x50] sm:$0xff] }
 0x566   :  { %3608 = vmatprep.subr.msk.mxu1 %vm217_vm2, %v863_v63 }
 0x569   :  { %3609 = vmatpush3.xpose.msk.msra.mxu1 %vm217_vm2, %v863_v63  ;;  %v1611_v63 = vld [vmem:[#allocation6 + $0x48] sm:$0xff] }
 0x56a   :  { %3610 = vmatprep.subr.msk.mxu1 %vm217_vm2, %v862_v2 }
 0x56d   :  { %3611 = vmatpush3.xpose.msk.msra.mxu1 %vm217_vm2, %v862_v2  ;;  %v1610_v2 = vld [vmem:[#allocation6 + $0x40] sm:$0xff] }
 0x56e   :  { %3626 = vmatprep.subr.mxu1 %v3930_v0 }
 0x620   :  { %v765_v51 = vpop.f32.mrf.mxu1 }
 0x621   :  { %v770_v52 = vrot.slane %v765_v51, 4  ;;  %v1617_v51 = vld [vmem:[#allocation6 + $0x78] sm:$0xff] }
 0x622   :  { %v3592_v53 = vpop.f32.mrf.mxu1 }
 0x623   :  { %v772_v54 = vadd.f32 %v770_v52, %v4084_v13  ;;  %v1632_v52 = vld [vmem:[#allocation6 + $0xf0] sm:$0xff] }
 0x624   :  { %v1616_v53 = vld [vmem:[#allocation6 + $0x70] sm:$0xff] }
 0x625   :  { %3766 = vtanh.f32 %v772_v54  ;;  %v1631_v54 = vld [vmem:[#allocation6 + $0xe8] sm:$0xff] }
 0x632   :  { %v3767_v55 = vpop.eup %3766 }
 0x633   :  { %v775_v57 = vrot.slane %v3767_v55, 4  ;;  %v860_v58 = vsel %vm855_vm4, %v859_v56, %v3767_v55  ;;  %v1615_v55 = vld [vmem:[#allocation6 + $0x68] sm:$0xff]  ;;  %v1630_v56 = vld [vmem:[#allocation6 + $0xe0] sm:$0xff] }
 0x635   :  { %3602 = vmatmul.mubr.msk.f32.vlgmr.msra.gmra.mxu0 %vm217_vm2, %v775_v57  ;;  %v1614_v57 = vld [vmem:[#allocation6 + $0x60] sm:$0xff] }
 0x636   :  { %3623 = vmatprep.mubr.msk.f32.mxu0 %vm3931_vm0, %v3930_v0  ;;  %3616 = vmatpush3.xpose.msk.msra.mxu0 %vm217_vm2, %v4175_v60 }
 0x637   :  { %3617 = vmatprep.subr.mxu0 %v3930_v0 }
 0x63a   :  { %3618 = vmatpush3.xpose.msk.msra.mxu0 %vm217_vm2, %v4181_v62 }
 0x63b   :  { %3619 = vmatprep.subr.mxu0 %v3930_v0 }
 0x63e   :  { %3620 = vmatpush3.xpose.msk.msra.mxu0 %vm217_vm2, %v4188_v1 }
 0x63f   :  { %3621 = vmatprep.subr.mxu0 %v3930_v0 }
 0x642   :  { %3622 = vmatpush3.xpose.msk.msra.mxu0 %vm217_vm2, %v4195_v3 }
 0x643   :  { %3637 = vmatprep.subr.mxu0 %v3930_v0 }
 0x645   :  { %3624 = vmatmul.mubr.f32.vlgmr.msra.gmra.mxu0 %v3930_v0 }
 0x646   :  { %3638 = vmatpush3.xpose.msk.msra.mxu0 %vm217_vm2, %v4175_v60  ;;  %3645 = vmatprep.mubr.msk.f32.mxu0 %vm3931_vm0, %v3930_v0 }
 0x647   :  { %3639 = vmatprep.subr.mxu0 %v3930_v0 }
 0x64a   :  { %3640 = vmatpush3.xpose.msk.msra.mxu0 %vm217_vm2, %v4181_v62 }
 0x64b   :  { %3641 = vmatprep.subr.mxu0 %v3930_v0 }
 0x64e   :  { %3642 = vmatpush3.xpose.msk.msra.mxu0 %vm217_vm2, %v4188_v1 }
 0x64f   :  { %3643 = vmatprep.subr.mxu0 %v3930_v0 }
 0x652   :  { %3644 = vmatpush3.xpose.msk.msra.mxu0 %vm217_vm2, %v4195_v3 }
 0x653   :  { %3659 = vmatprep.subr.mxu0 %v3930_v0 }
 0x6f5   :  { %v844_v4 = vpop.f32.mrf.mxu0 }
 0x6f6   :  { %v849_v5 = vrot.slane %v844_v4, 2  ;;  %v1609_v4 = vld [vmem:[#allocation6 + $0x38] sm:$0xff] }
 0x6f7   :  { %v3603_v6 = vpop.f32.mrf.mxu0 }
 0x6f8   :  { %v851_v7 = vadd.f32 %v849_v5, %v4084_v13  ;;  %v1624_v5 = vld [vmem:[#allocation6 + $0xb0] sm:$0xff] }
 0x6f9   :  { %v1608_v6 = vld [vmem:[#allocation6 + $0x30] sm:$0xff] }
 0x6fa   :  { %3768 = vtanh.f32 %v851_v7  ;;  %v1623_v7 = vld [vmem:[#allocation6 + $0xa8] sm:$0xff] }
 0x705   :  { %v1042_v10 = vpop.f32.mrf.mxu0 }
 0x707   :  { %v3769_v8 = vpop.eup %3768  ;;  %v3625_v11 = vpop.f32.mrf.mxu0 }
 0x708   :  { %v861_v9 = vsel %vm857_vm5, %v860_v58, %v3769_v8  ;;  %v1629_v58 = vld [vmem:[#allocation6 + $0xd8] sm:$0xff]  ;;  %v1607_v8 = vld [vmem:[#allocation6 + $0x28] sm:$0xff] }
 0x709   :  { %3613 = vmatmul.mubr.msk.f32.vlgmr.msra.gmra.mxu1 %vm217_vm2, %v861_v9  ;;  %v1622_v9 = vld [vmem:[#allocation6 + $0xa0] sm:$0xff]  ;;  %v1621_v11 = vld [vmem:[#allocation6 + $0x98] sm:$0xff] }
 0x70a   :  { %3627 = vmatpush3.xpose.msk.msra.mxu1 %vm217_vm2, %v4175_v60  ;;  %3634 = vmatprep.mubr.msk.f32.mxu1 %vm3931_vm0, %v3930_v0 }
 0x70b   :  { %3628 = vmatprep.subr.mxu1 %v3930_v0 }
 0x70e   :  { %3629 = vmatpush3.xpose.msk.msra.mxu1 %vm217_vm2, %v4181_v62 }
 0x70f   :  { %3630 = vmatprep.subr.mxu1 %v3930_v0 }
 0x712   :  { %3631 = vmatpush3.xpose.msk.msra.mxu1 %vm217_vm2, %v4188_v1 }
 0x713   :  { %3632 = vmatprep.subr.mxu1 %v3930_v0 }
 0x716   :  { %3633 = vmatpush3.xpose.msk.msra.mxu1 %vm217_vm2, %v4195_v3 }
 0x717   :  { %3648 = vmatprep.subr.mxu1 %v3930_v0 }
 0x7c9   :  { %v3614_v13 = vpop.f32.mrf.mxu1 }
 0x7ca   :  { %v4234_v14 = vadd.f32 %v3614_v13, %v870_v12  ;;  %v1620_v13 = vld [vmem:[#allocation6 + $0x90] sm:$0xff] }
 0x7cb   :  { %v955_v15 = vpop.f32.mrf.mxu1 }
 0x7cc   :  { %v956_v16 = vadd.f32 %v955_v15, %v870_v12  ;;  %v1605_v12 = vld [vmem:[#allocation6 + $0x18] sm:$0xff]  ;;  %v1604_v15 = vld [vmem:[#allocation6 + $0x10] sm:$0xff] }
 0x7ce   :  { %v1046_v17 = vadd.f32 %v1042_v10, %v956_v16  ;;  %v1606_v10 = vld [vmem:[#allocation6 + $0x20] sm:$0xff] }
 0x7d0   :  { %3770 = vtanh.f32 %v1046_v17  ;;  %v1603_v17 = vld [vmem:[#allocation6 + $0x8] sm:$0xff] }
 0x7dd   :  { %v3771_v18 = vpop.eup %3770 }
 0x7de   :  { %3635 = vmatmul.mubr.msk.f32.vlgmr.msra.gmra.mxu1 %vm217_vm2, %v3771_v18 }
 0x7df   :  { %3649 = vmatpush3.xpose.msk.msra.mxu1 %vm217_vm2, %v4175_v60  ;;  %3656 = vmatprep.mubr.msk.f32.mxu1 %vm3931_vm0, %v3930_v0 }
 0x7e0   :  { %3650 = vmatprep.subr.mxu1 %v3930_v0 }
 0x7e3   :  { %3651 = vmatpush3.xpose.msk.msra.mxu1 %vm217_vm2, %v4181_v62 }
 0x7e4   :  { %3652 = vmatprep.subr.mxu1 %v3930_v0 }
 0x7e7   :  { %3653 = vmatpush3.xpose.msk.msra.mxu1 %vm217_vm2, %v4188_v1 }
 0x7e8   :  { %3654 = vmatprep.subr.mxu1 %v3930_v0 }
 0x7eb   :  { %3655 = vmatpush3.xpose.msk.msra.mxu1 %vm217_vm2, %v4195_v3 }
 0x7ec   :  { %3670 = vmatprep.subr.mxu1 %v3930_v0 }
 0x89e   :  { %v1117_v19 = vpop.f32.mrf.mxu1 }
 0x89f   :  { %v1122_v20 = vrot.slane %v1117_v19, 6  ;;  %v1602_v19 = vld [vmem:[#allocation6] sm:$0xff] }
 0x8a0   :  { %v3636_v21 = vpop.f32.mrf.mxu1 }
 0x8a1   :  { %v1124_v22 = vadd.f32 %v1122_v20, %v956_v16  ;;  %v1665_v20 = vld [vmem:[#allocation6 + $0x1f8] sm:$0xff] }
 0x8a2   :  { %v1681_v21 = vld [vmem:[#allocation6 + $0x278] sm:$0xff] }
 0x8a3   :  { %3772 = vtanh.f32 %v1124_v22  ;;  %v1680_v22 = vld [vmem:[#allocation6 + $0x270] sm:$0xff] }
 0x8b0   :  { %v3773_v23 = vpop.eup %3772 }
 0x8b1   :  { %v1127_v24 = vrot.slane %v3773_v23, 2  ;;  %v1596_v30 = vsel %vm853_vm3, %v3771_v18, %v3773_v23  ;;  %v1618_v18 = vld [vmem:[#allocation6 + $0x80] sm:$0xff]  ;;  %v1679_v23 = vld [vmem:[#allocation6 + $0x268] sm:$0xff] }
 0x8b3   :  { %3646 = vmatmul.mubr.msk.f32.vlgmr.msra.gmra.mxu0 %vm217_vm2, %v1127_v24  ;;  %v1678_v24 = vld [vmem:[#allocation6 + $0x260] sm:$0xff] }
 0x8b4   :  { %3660 = vmatpush3.xpose.msk.msra.mxu0 %vm217_vm2, %v4175_v60  ;;  %3667 = vmatprep.mubr.msk.f32.mxu0 %vm3931_vm0, %v3930_v0 }
 0x8b5   :  { %3661 = vmatprep.subr.mxu0 %v3930_v0 }
 0x8b8   :  { %3662 = vmatpush3.xpose.msk.msra.mxu0 %vm217_vm2, %v4181_v62 }
 0x8b9   :  { %3663 = vmatprep.subr.mxu0 %v3930_v0 }
 0x8bc   :  { %3664 = vmatpush3.xpose.msk.msra.mxu0 %vm217_vm2, %v4188_v1 }
 0x8bd   :  { %3665 = vmatprep.subr.mxu0 %v3930_v0 }
 0x8c0   :  { %3666 = vmatpush3.xpose.msk.msra.mxu0 %vm217_vm2, %v4195_v3 }
 0x8c1   :  { %3681 = vmatprep.subr.mxu0 %v3930_v0 }
 0x973   :  { %v1196_v25 = vpop.f32.mrf.mxu0 }
 0x974   :  { %v1201_v26 = vrot.slane %v1196_v25, 4  ;;  %v1677_v25 = vld [vmem:[#allocation6 + $0x258] sm:$0xff] }
 0x975   :  { %v3647_v27 = vpop.f32.mrf.mxu0 }
 0x976   :  { %v1203_v28 = vadd.f32 %v1201_v26, %v956_v16  ;;  %v1676_v26 = vld [vmem:[#allocation6 + $0x250] sm:$0xff]  ;;  %v1675_v27 = vld [vmem:[#allocation6 + $0x248] sm:$0xff] }
 0x978   :  { %3774 = vtanh.f32 %v1203_v28  ;;  %v1674_v28 = vld [vmem:[#allocation6 + $0x240] sm:$0xff] }
 0x985   :  { %v3775_v29 = vpop.eup %3774 }
 0x986   :  { %v1206_v31 = vrot.slane %v3775_v29, 4  ;;  %v1597_v32 = vsel %vm855_vm4, %v1596_v30, %v3775_v29  ;;  %v1673_v29 = vld [vmem:[#allocation6 + $0x238] sm:$0xff]  ;;  %v1672_v30 = vld [vmem:[#allocation6 + $0x230] sm:$0xff] }
 0x988   :  { %3657 = vmatmul.mubr.msk.f32.vlgmr.msra.gmra.mxu1 %vm217_vm2, %v1206_v31  ;;  %v1671_v31 = vld [vmem:[#allocation6 + $0x228] sm:$0xff] }
 0x989   :  { %3671 = vmatpush3.xpose.msk.msra.mxu1 %vm217_vm2, %v4175_v60  ;;  %3678 = vmatprep.mubr.msk.f32.mxu1 %vm3931_vm0, %v3930_v0 }
 0x98a   :  { %3672 = vmatprep.subr.mxu1 %v3930_v0 }
 0x98d   :  { %3673 = vmatpush3.xpose.msk.msra.mxu1 %vm217_vm2, %v4181_v62 }
 0x98e   :  { %3674 = vmatprep.subr.mxu1 %v3930_v0 }
 0x991   :  { %3675 = vmatpush3.xpose.msk.msra.mxu1 %vm217_vm2, %v4188_v1 }
 0x992   :  { %3676 = vmatprep.subr.mxu1 %v3930_v0 }
 0x995   :  { %3677 = vmatpush3.xpose.msk.msra.mxu1 %vm217_vm2, %v4195_v3 }
 0x996   :  { %3692 = vmatprep.subr.mxu1 %v3930_v0 }
 0xa48   :  { %v1275_v33 = vpop.f32.mrf.mxu1 }
 0xa49   :  { %v1280_v34 = vrot.slane %v1275_v33, 2 }
 0xa4a   :  { %v3658_v35 = vpop.f32.mrf.mxu1 }
 0xa4b   :  { %v1282_v36 = vadd.f32 %v1280_v34, %v956_v16  ;;  %v1619_v16 = vld [vmem:[#allocation6 + $0x88] sm:$0xff] }
 0xa4d   :  { %3776 = vtanh.f32 %v1282_v36 }
 0xa5a   :  { %v3777_v37 = vpop.eup %3776 }
 0xa5b   :  { %v1285_v38 = vrot.slane %v3777_v37, 6  ;;  %v4284_v39 = vsel %vm857_vm5, %v1597_v32, %v3777_v37  ;;  %v1670_v32 = vld [vmem:[#allocation6 + $0x220] sm:$0xff]  ;;  %v1669_v37 = vld [vmem:[#allocation6 + $0x218] sm:$0xff] }
 0xa5d   :  { %3668 = vmatmul.mubr.msk.f32.vlgmr.msra.gmra.mxu0 %vm217_vm2, %v1285_v38  ;;  %v1668_v38 = vld [vmem:[#allocation6 + $0x210] sm:$0xff] }
 0xa5e   :  { %3682 = vmatpush3.xpose.msk.msra.mxu0 %vm217_vm2, %v4175_v60  ;;  %3689 = vmatprep.mubr.msk.f32.mxu0 %vm3931_vm0, %v3930_v0 }
 0xa5f   :  { %3683 = vmatprep.subr.mxu0 %v3930_v0 }
 0xa62   :  { %3684 = vmatpush3.xpose.msk.msra.mxu0 %vm217_vm2, %v4181_v62 }
 0xa63   :  { %3685 = vmatprep.subr.mxu0 %v3930_v0 }
 0xa66   :  { %3686 = vmatpush3.xpose.msk.msra.mxu0 %vm217_vm2, %v4188_v1 }
 0xa67   :  { %3687 = vmatprep.subr.mxu0 %v3930_v0 }
 0xa6a   :  { %3688 = vmatpush3.xpose.msk.msra.mxu0 %vm217_vm2, %v4195_v3 }
 0xa6b   :  { %3418 = vmatprep.subr.msk.mxu0 %vm217_vm2, %v1633_v44 }
 0xb1d   :  { %v1354_v40 = vpop.f32.mrf.mxu0 }
 0xb1e   :  { %v1358_v41 = vadd.f32 %v1354_v40, %v4234_v14  ;;  %v1667_v40 = vld [vmem:[#allocation6 + $0x208] sm:$0xff] }
 0xb1f   :  { %v3669_v42 = vpop.f32.mrf.mxu0 }
 0xb20   :  { %3778 = vtanh.f32 %v1358_v41  ;;  %v1666_v41 = vld [vmem:[#allocation6 + $0x200] sm:$0xff] }
 0xb2d   :  { %v4301_v43 = vpop.eup %3778 }
 0xb2e   :  { %3679 = vmatmul.mubr.msk.f32.vlgmr.msra.gmra.mxu1 %vm217_vm2, %v4301_v43 }
 0xb2f   :  { %3693 = vmatpush3.xpose.msk.msra.mxu1 %vm217_vm2, %v4175_v60  ;;  %3700 = vmatprep.mubr.msk.f32.mxu1 %vm3931_vm0, %v3930_v0  ;;  %v1628_v60 = vld [vmem:[#allocation6 + $0xd0] sm:$0xff] }
 0xb30   :  { %3694 = vmatprep.subr.mxu1 %v3930_v0 }
 0xb33   :  { %3695 = vmatpush3.xpose.msk.msra.mxu1 %vm217_vm2, %v4181_v62  ;;  %v1627_v62 = vld [vmem:[#allocation6 + $0xc8] sm:$0xff] }
 0xb34   :  { %3696 = vmatprep.subr.mxu1 %v3930_v0 }
 0xb37   :  { %3697 = vmatpush3.xpose.msk.msra.mxu1 %vm217_vm2, %v4188_v1  ;;  %v1626_v1 = vld [vmem:[#allocation6 + $0xc0] sm:$0xff] }
 0xb38   :  { %3698 = vmatprep.subr.mxu1 %v3930_v0 }
 0xb3b   :  { %3699 = vmatpush3.xpose.msk.msra.mxu1 %vm217_vm2, %v4195_v3  ;;  %v1625_v3 = vld [vmem:[#allocation6 + $0xb8] sm:$0xff] }
 0xb3c   :  { %3454 = vmatprep.subr.msk.mxu1 %vm217_vm2, %v1665_v20  ;;  %v1634_v20 = vld [vmem:[#allocation6 + $0x100] sm:$0xff] }
 0xbee   :  { %v1429_v45 = vpop.f32.mrf.mxu1 }
 0xbef   :  { %v1434_v46 = vrot.slane %v1429_v45, 6 }
 0xbf0   :  { %v3680_v47 = vpop.f32.mrf.mxu1 }
 0xbf1   :  { %v1436_v48 = vadd.f32 %v1434_v46, %v4234_v14  ;;  %v1649_v46 = vld [vmem:[#allocation6 + $0x178] sm:$0xff] }
 0xbf3   :  { %3780 = vtanh.f32 %v1436_v48  ;;  %v1664_v48 = vld [vmem:[#allocation6 + $0x1f0] sm:$0xff] }
 0xc00   :  { %v4320_v49 = vpop.eup %3780 }
 0xc01   :  { %v1439_v50 = vrot.slane %v4320_v49, 2  ;;  %v1599_v44 = vsel %vm853_vm3, %v4301_v43, %v4320_v49  ;;  %v1663_v43 = vld [vmem:[#allocation6 + $0x1e8] sm:$0xff]  ;;  %v1692_v49 = vld [vmem:[#allocation6 + $0x2d0] sm:$0xff] }
 0xc03   :  { %3690 = vmatmul.mubr.msk.f32.vlgmr.msra.gmra.mxu0 %vm217_vm2, %v1439_v50  ;;  %v1693_v50 = vld [vmem:[#allocation6 + $0x2d8] sm:$0xff] }
 0xc04   :  { %3419 = vmatpush3.xpose.msk.msra.mxu0 %vm217_vm2, %v1617_v51  ;;  %3450 = vmatprep.mubr.msk.f32.mxu0 %vm217_vm2, %v4284_v39  ;;  %v1648_v51 = vld [vmem:[#allocation6 + $0x170] sm:$0xff] }
 0xc05   :  { %3420 = vmatprep.subr.msk.mxu0 %vm217_vm2, %v1632_v52  ;;  %v1647_v52 = vld [vmem:[#allocation6 + $0x168] sm:$0xff] }
 0xc08   :  { %3421 = vmatpush3.xpose.msk.msra.mxu0 %vm217_vm2, %v1616_v53  ;;  %v1662_v53 = vld [vmem:[#allocation6 + $0x1e0] sm:$0xff] }
 0xc09   :  { %3422 = vmatprep.subr.msk.mxu0 %vm217_vm2, %v1631_v54  ;;  %v1691_v54 = vld [vmem:[#allocation6 + $0x2c8] sm:$0xff] }
 0xc0c   :  { %3423 = vmatpush3.xpose.msk.msra.mxu0 %vm217_vm2, %v1615_v55  ;;  %v1646_v55 = vld [vmem:[#allocation6 + $0x160] sm:$0xff] }
 0xc0d   :  { %3424 = vmatprep.subr.msk.mxu0 %vm217_vm2, %v1630_v56  ;;  %v1661_v56 = vld [vmem:[#allocation6 + $0x1d8] sm:$0xff] }
 0xc10   :  { %3425 = vmatpush3.xpose.msk.msra.mxu0 %vm217_vm2, %v1614_v57  ;;  %v1690_v57 = vld [vmem:[#allocation6 + $0x2c0] sm:$0xff] }
 0xc11   :  { %3426 = vmatprep.subr.msk.mxu0 %vm217_vm2, %v1629_v58  ;;  %v1645_v58 = vld [vmem:[#allocation6 + $0x158] sm:$0xff] }
 0xc14   :  { %3427 = vmatpush3.xpose.msk.msra.mxu0 %vm217_vm2, %v1613_v59  ;;  %v1660_v59 = vld [vmem:[#allocation6 + $0x1d0] sm:$0xff] }
 0xc15   :  { %3428 = vmatprep.subr.msk.mxu0 %vm217_vm2, %v1628_v60  ;;  %v1689_v60 = vld [vmem:[#allocation6 + $0x2b8] sm:$0xff] }
 0xc18   :  { %3429 = vmatpush3.xpose.msk.msra.mxu0 %vm217_vm2, %v1612_v61  ;;  %v1644_v61 = vld [vmem:[#allocation6 + $0x150] sm:$0xff] }
 0xc19   :  { %3430 = vmatprep.subr.msk.mxu0 %vm217_vm2, %v1627_v62  ;;  %v1659_v62 = vld [vmem:[#allocation6 + $0x1c8] sm:$0xff] }
 0xc1c   :  { %3431 = vmatpush3.xpose.msk.msra.mxu0 %vm217_vm2, %v1611_v63  ;;  %v1688_v63 = vld [vmem:[#allocation6 + $0x2b0] sm:$0xff] }
 0xc1d   :  { %3432 = vmatprep.subr.msk.mxu0 %vm217_vm2, %v1626_v1  ;;  %v1643_v1 = vld [vmem:[#allocation6 + $0x148] sm:$0xff] }
 0xc20   :  { %3433 = vmatpush3.xpose.msk.msra.mxu0 %vm217_vm2, %v1610_v2  ;;  %v1658_v2 = vld [vmem:[#allocation6 + $0x1c0] sm:$0xff] }
 0xc21   :  { %3434 = vmatprep.subr.msk.mxu0 %vm217_vm2, %v1625_v3  ;;  %v1642_v3 = vld [vmem:[#allocation6 + $0x140] sm:$0xff] }
 0xc24   :  { %3435 = vmatpush3.xpose.msk.msra.mxu0 %vm217_vm2, %v1609_v4  ;;  %v1657_v4 = vld [vmem:[#allocation6 + $0x1b8] sm:$0xff] }
 0xc25   :  { %3436 = vmatprep.subr.msk.mxu0 %vm217_vm2, %v1624_v5  ;;  %v1641_v5 = vld [vmem:[#allocation6 + $0x138] sm:$0xff] }
 0xc28   :  { %3437 = vmatpush3.xpose.msk.msra.mxu0 %vm217_vm2, %v1608_v6  ;;  %v1656_v6 = vld [vmem:[#allocation6 + $0x1b0] sm:$0xff] }
 0xc29   :  { %3438 = vmatprep.subr.msk.mxu0 %vm217_vm2, %v1623_v7  ;;  %v1640_v7 = vld [vmem:[#allocation6 + $0x130] sm:$0xff] }
 0xc2c   :  { %3439 = vmatpush3.xpose.msk.msra.mxu0 %vm217_vm2, %v1607_v8  ;;  %v1655_v8 = vld [vmem:[#allocation6 + $0x1a8] sm:$0xff] }
 0xc2d   :  { %3440 = vmatprep.subr.msk.mxu0 %vm217_vm2, %v1622_v9  ;;  %v1639_v9 = vld [vmem:[#allocation6 + $0x128] sm:$0xff] }
 0xc30   :  { %3441 = vmatpush3.xpose.msk.msra.mxu0 %vm217_vm2, %v1606_v10  ;;  %v1654_v10 = vld [vmem:[#allocation6 + $0x1a0] sm:$0xff] }
 0xc31   :  { %3442 = vmatprep.subr.msk.mxu0 %vm217_vm2, %v1621_v11  ;;  %v1638_v11 = vld [vmem:[#allocation6 + $0x120] sm:$0xff] }
 0xc34   :  { %3443 = vmatpush3.xpose.msk.msra.mxu0 %vm217_vm2, %v1605_v12  ;;  %v1653_v12 = vld [vmem:[#allocation6 + $0x198] sm:$0xff] }
 0xc35   :  { %3444 = vmatprep.subr.msk.mxu0 %vm217_vm2, %v1620_v13  ;;  %v1637_v13 = vld [vmem:[#allocation6 + $0x118] sm:$0xff] }
 0xc38   :  { %3445 = vmatpush3.xpose.msk.msra.mxu0 %vm217_vm2, %v1604_v15  ;;  %v1652_v15 = vld [vmem:[#allocation6 + $0x190] sm:$0xff] }
 0xc39   :  { %3446 = vmatprep.subr.msk.mxu0 %vm217_vm2, %v1619_v16  ;;  %v1636_v16 = vld [vmem:[#allocation6 + $0x110] sm:$0xff] }
 0xc3c   :  { %3447 = vmatpush3.xpose.msk.msra.mxu0 %vm217_vm2, %v1603_v17  ;;  %v1651_v17 = vld [vmem:[#allocation6 + $0x188] sm:$0xff] }
 0xc3d   :  { %3448 = vmatprep.subr.msk.mxu0 %vm217_vm2, %v1618_v18  ;;  %v1635_v18 = vld [vmem:[#allocation6 + $0x108] sm:$0xff] }
 0xc40   :  { %3449 = vmatpush3.xpose.msk.msra.mxu0 %vm217_vm2, %v1602_v19  ;;  %v1650_v19 = vld [vmem:[#allocation6 + $0x180] sm:$0xff] }
 0xc41   :  { %2165 = vmatprep.subr.mxu0 %v3930_v0 }
 0xc43   :  { %3451 = vmatmul.mubr.msk.f32.vlgmr.msra.gmra.mxu0 %vm217_vm2, %v4284_v39 }
 0xc44   :  { %3269 = vmatpush1.xpose.msk.msra.mxu0 %vm217_vm2, %v1681_v21  ;;  %v1687_v21 = vld [vmem:[#allocation6 + $0x2a8] sm:$0xff] }
 0xc45   :  { %2167 = vmatprep.subr.mxu0 %v3930_v0 }
 0xc48   :  { %3270 = vmatpush1.xpose.msk.msra.mxu0 %vm217_vm2, %v1680_v22  ;;  %v1686_v22 = vld [vmem:[#allocation6 + $0x2a0] sm:$0xff] }
 0xc49   :  { %2169 = vmatprep.subr.mxu0 %v3930_v0 }
 0xc4c   :  { %3271 = vmatpush1.xpose.msk.msra.mxu0 %vm217_vm2, %v1679_v23  ;;  %v1685_v23 = vld [vmem:[#allocation6 + $0x298] sm:$0xff] }
 0xc4d   :  { %2171 = vmatprep.subr.mxu0 %v3930_v0 }
 0xc50   :  { %3272 = vmatpush1.xpose.msk.msra.mxu0 %vm217_vm2, %v1678_v24  ;;  %v1684_v24 = vld [vmem:[#allocation6 + $0x290] sm:$0xff] }
 0xc51   :  { %2173 = vmatprep.subr.mxu0 %v3930_v0 }
 0xc54   :  { %3273 = vmatpush1.xpose.msk.msra.mxu0 %vm217_vm2, %v1677_v25  ;;  %v1683_v25 = vld [vmem:[#allocation6 + $0x288] sm:$0xff] }
 0xc55   :  { %2175 = vmatprep.subr.mxu0 %v3930_v0 }
 0xc58   :  { %3274 = vmatpush1.xpose.msk.msra.mxu0 %vm217_vm2, %v1676_v26  ;;  %v4458_v26 = vld [vmem:[#allocation7 + $0x8] sm:$0xff] }
 0xc59   :  { %2177 = vmatprep.subr.mxu0 %v3930_v0 }
 0xc5c   :  { %3275 = vmatpush1.xpose.msk.msra.mxu0 %vm217_vm2, %v1675_v27  ;;  %v1682_v27 = vld [vmem:[#allocation6 + $0x280] sm:$0xff] }
 0xc5d   :  { %2179 = vmatprep.subr.mxu0 %v3930_v0 }
 0xc60   :  { %3276 = vmatpush1.xpose.msk.msra.mxu0 %vm217_vm2, %v1674_v28  ;;  %v4460_v28 = vld [vmem:[#allocation7] sm:$0xff] }
 0xc61   :  { %2181 = vmatprep.subr.mxu0 %v3930_v0 }
 0xc64   :  { %3277 = vmatpush1.xpose.msk.msra.mxu0 %vm217_vm2, %v1673_v29  ;;  %v1699_v29 = vlaneseq }
 0xc65   :  { %2183 = vmatprep.subr.mxu0 %v3930_v0 }
 0xc68   :  { %3278 = vmatpush1.xpose.msk.msra.mxu0 %vm217_vm2, %v1672_v30  ;;  %v4465_v30 = vshrl.u32 %v1699_v29, 7 }
 0xc69   :  { %2185 = vmatprep.subr.mxu0 %v3930_v0 }
 0xc6c   :  { %3279 = vmatpush1.xpose.msk.msra.mxu0 %vm217_vm2, %v1671_v31  ;;  %v1701_v31 = vsub.s32 0, %v4465_v30 }
 0xc6d   :  { %2187 = vmatprep.subr.mxu0 %v3930_v0 }
 0xc70   :  { %3280 = vmatpush1.xpose.msk.msra.mxu0 %vm217_vm2, %v1670_v32  ;;  %v2605_v32 = vld [vmem:[#allocation10 + $0x5] ss:$8 sm:$0x3] }
 0xc71   :  { %2189 = vmatprep.subr.mxu0 %v3930_v0 }
 0xc74   :  { %3281 = vmatpush1.xpose.msk.msra.mxu0 %vm217_vm2, %v1669_v37 }
 0xc75   :  { %2191 = vmatprep.subr.mxu0 %v3930_v0 }
 0xc78   :  { %3282 = vmatpush1.xpose.msk.msra.mxu0 %vm217_vm2, %v1668_v38 }
 0xc79   :  { %2193 = vmatprep.subr.mxu0 %v3930_v0 }
 0xc7c   :  { %3283 = vmatpush1.xpose.msk.msra.mxu0 %vm217_vm2, %v1667_v40 }
 0xc7d   :  { %2195 = vmatprep.subr.mxu0 %v3930_v0 }
 0xc80   :  { %3284 = vmatpush1.xpose.msk.msra.mxu0 %vm217_vm2, %v1666_v41 }
 0xc81   :  { %2205 = vmatprep.subr.mxu0 %v3930_v0 }
 0xc84   :  { %3285 = vmatpush2.xpose.msk.msra.mxu0 %vm217_vm2, %v1693_v50 }
 0xc85   :  { %2207 = vmatprep.subr.mxu0 %v3930_v0 }
 0xc88   :  { %3286 = vmatpush2.xpose.msk.msra.mxu0 %vm217_vm2, %v1692_v49 }
 0xc89   :  { %2209 = vmatprep.subr.mxu0 %v3930_v0 }
 0xc8c   :  { %3287 = vmatpush2.xpose.msk.msra.mxu0 %vm217_vm2, %v1691_v54 }
 0xc8d   :  { %2211 = vmatprep.subr.mxu0 %v3930_v0 }
 0xc90   :  { %3288 = vmatpush2.xpose.msk.msra.mxu0 %vm217_vm2, %v1690_v57  ;;  %v1713_v57 = vsub.s32 3, %v4465_v30 }
 0xc91   :  { %2213 = vmatprep.subr.mxu0 %v3930_v0 }
 0xc94   :  { %3289 = vmatpush2.xpose.msk.msra.mxu0 %vm217_vm2, %v1689_v60 }
 0xc95   :  { %2215 = vmatprep.subr.mxu0 %v3930_v0 }
 0xc98   :  { %3290 = vmatpush2.xpose.msk.msra.mxu0 %vm217_vm2, %v1688_v63 }
 0xc99   :  { %2217 = vmatprep.subr.mxu0 %v3930_v0 }
 0xc9c   :  { %3291 = vmatpush2.xpose.msk.msra.mxu0 %vm217_vm2, %v1687_v21 }
 0xc9d   :  { %2219 = vmatprep.subr.mxu0 %v3930_v0 }
 0xca0   :  { %3292 = vmatpush2.xpose.msk.msra.mxu0 %vm217_vm2, %v1686_v22 }
 0xca1   :  { %2221 = vmatprep.subr.mxu0 %v3930_v0 }
 0xca4   :  { %3293 = vmatpush2.xpose.msk.msra.mxu0 %vm217_vm2, %v1685_v23 }
 0xca5   :  { %2223 = vmatprep.subr.mxu0 %v3930_v0 }
 0xca8   :  { %3294 = vmatpush2.xpose.msk.msra.mxu0 %vm217_vm2, %v1684_v24 }
 0xca9   :  { %2225 = vmatprep.subr.mxu0 %v3930_v0 }
 0xcac   :  { %3295 = vmatpush2.xpose.msk.msra.mxu0 %vm217_vm2, %v1683_v25 }
 0xcad   :  { %2227 = vmatprep.subr.mxu0 %v3930_v0 }
 0xcb0   :  { %3296 = vmatpush2.xpose.msk.msra.mxu0 %vm217_vm2, %v1682_v27 }
 0xcc3   :  { %v1508_v33 = vpop.f32.mrf.mxu0 }
 0xcc4   :  { %v1513_v34 = vrot.slane %v1508_v33, 4  ;;  %v2670_v33 = vrot.slane %v2605_v32, %v1701_v31 }
 0xcc5   :  { %v3691_v35 = vpop.f32.mrf.mxu0 }
 0xcc6   :  { %v1515_v36 = vadd.f32 %v1513_v34, %v4234_v14  ;;  %v1705_v34 = vsub.s32 1, %v4465_v30  ;;  %2675 = vrot.lane.b32.xlu0 %v2670_v33, %s3932_s0 }
 0xcc8   :  { %3782 = vtanh.f32 %v1515_v36  ;;  %v2674_v35 = vrot.slane %v2605_v32, %v1705_v34  ;;  %v2607_v36 = vld [vmem:[#allocation10 + $0x6] ss:$8 sm:$0x3] }
 0xcc9   :  { %v2691_v37 = vrot.slane %v2607_v36, %v1701_v31  ;;  %v2695_v38 = vrot.slane %v2607_v36, %v1705_v34 }
 0xcca   :  { %2677 = vrot.lane.b32.xlu0 %v2674_v35, %s3932_s0 }
 0xccb   :  { %2696 = vrot.lane.b32.xlu1 %v2691_v37, %s3932_s0 }
 0xccf   :  { %2698 = vrot.lane.b32.xlu1 %v2695_v38, %s3932_s0 }
 0xcd5   :  { %v3783_v42 = vpop.eup %3782 }
 0xcd6   :  { %v1518_v45 = vrot.slane %v3783_v42, 4  ;;  %v4398_v47 = vsel %vm855_vm4, %v1599_v44, %v3783_v42 }
 0xcd8   :  { %3701 = vmatmul.mubr.msk.f32.vlgmr.msra.gmra.mxu1 %vm217_vm2, %v1518_v45  ;;  %v1695_v45 = vld [vmem:[#allocation10 + $0x2] ss:$8 sm:$0xf] }
 0xcd9   :  { %3455 = vmatpush3.xpose.msk.msra.mxu1 %vm217_vm2, %v1649_v46  ;;  %3486 = vmatprep.mubr.msk.f32.mxu1 %vm217_vm2, %v4284_v39  ;;  %v1696_v46 = vld [vmem:[#allocation10 + $0x2] ss:$8 sm:$0x30] }
 0xcda   :  { %3456 = vmatprep.subr.msk.mxu1 %vm217_vm2, %v1664_v48  ;;  %v1697_v50 = vor.u32 %v1696_v46, %v1695_v45 }
 0xcdc   :  { %v1702_v49 = vrot.slane %v1697_v50, %v1701_v31 }
 0xcdd   :  { %3457 = vmatpush3.xpose.msk.msra.mxu1 %vm217_vm2, %v1648_v51  ;;  %v1706_v51 = vrot.slane %v1697_v50, %v1705_v34 }
 0xcde   :  { %3458 = vmatprep.subr.msk.mxu1 %vm217_vm2, %v1663_v43 }
 0xce1   :  { %3459 = vmatpush3.xpose.msk.msra.mxu1 %vm217_vm2, %v1647_v52 }
 0xce2   :  { %3460 = vmatprep.subr.msk.mxu1 %vm217_vm2, %v1662_v53 }
 0xce5   :  { %3461 = vmatpush3.xpose.msk.msra.mxu1 %vm217_vm2, %v1646_v55 }
 0xce6   :  { %3462 = vmatprep.subr.msk.mxu1 %vm217_vm2, %v1661_v56 }
 0xce9   :  { %3463 = vmatpush3.xpose.msk.msra.mxu1 %vm217_vm2, %v1645_v58 }
 0xcea   :  { %3464 = vmatprep.subr.msk.mxu1 %vm217_vm2, %v1660_v59  ;;  %v1714_v59 = vrot.slane %v1697_v50, %v1713_v57 }
 0xced   :  { %3465 = vmatpush3.xpose.msk.msra.mxu1 %vm217_vm2, %v1644_v61 }
 0xcee   :  { %3466 = vmatprep.subr.msk.mxu1 %vm217_vm2, %v1659_v62 }
 0xcf1   :  { %3467 = vmatpush3.xpose.msk.msra.mxu1 %vm217_vm2, %v1643_v1 }
 0xcf2   :  { %3468 = vmatprep.subr.msk.mxu1 %vm217_vm2, %v1658_v2 }
 0xcf5   :  { %3469 = vmatpush3.xpose.msk.msra.mxu1 %vm217_vm2, %v1642_v3 }
 0xcf6   :  { %3470 = vmatprep.subr.msk.mxu1 %vm217_vm2, %v1657_v4  ;;  %v1717_v4 = vsub.s32 4, %v4465_v30 }
 0xcf9   :  { %3471 = vmatpush3.xpose.msk.msra.mxu1 %vm217_vm2, %v1641_v5 }
 0xcfa   :  { %3472 = vmatprep.subr.msk.mxu1 %vm217_vm2, %v1656_v6 }
 0xcfd   :  { %3473 = vmatpush3.xpose.msk.msra.mxu1 %vm217_vm2, %v1640_v7  ;;  %v1721_v7 = vsub.s32 5, %v4465_v30 }
 0xcfe   :  { %3474 = vmatprep.subr.msk.mxu1 %vm217_vm2, %v1655_v8 }
 0xd01   :  { %3475 = vmatpush3.xpose.msk.msra.mxu1 %vm217_vm2, %v1639_v9  ;;  %v1718_v9 = vrot.slane %v1697_v50, %v1717_v4 }
 0xd02   :  { %3476 = vmatprep.subr.msk.mxu1 %vm217_vm2, %v1654_v10 }
 0xd03   :  { %v2077_v48 = vpop.f32.mrf.mxu0 }
 0xd04   :  { %v2078_v54 = vadd.f32 %v2077_v48, %v1702_v49 }
 0xd05   :  { %3477 = vmatpush3.xpose.msk.msra.mxu1 %vm217_vm2, %v1638_v11  ;;  %v2079_v43 = vpop.f32.mrf.mxu0 }
 0xd06   :  { %3478 = vmatprep.subr.msk.mxu1 %vm217_vm2, %v1653_v12  ;;  %v2080_v52 = vadd.f32 %v2079_v43, %v1706_v51 }
 0xd08   :  { %v2243_v56 = vmax.f32 %v2080_v52, 0.0 }
 0xd09   :  { %3479 = vmatpush3.xpose.msk.msra.mxu1 %vm217_vm2, %v1637_v13 }
 0xd0a   :  { %3480 = vmatprep.subr.msk.mxu1 %vm217_vm2, %v1652_v15 }
 0xd0d   :  { %3481 = vmatpush3.xpose.msk.msra.mxu1 %vm217_vm2, %v1636_v16 }
 0xd0e   :  { %3482 = vmatprep.subr.msk.mxu1 %vm217_vm2, %v1651_v17 }
 0xd11   :  { %3483 = vmatpush3.xpose.msk.msra.mxu1 %vm217_vm2, %v1635_v18  ;;  %v1722_v18 = vrot.slane %v1697_v50, %v1721_v7 }
 0xd12   :  { %3484 = vmatprep.subr.msk.mxu1 %vm217_vm2, %v1650_v19 }
 0xd15   :  { %3485 = vmatpush3.xpose.msk.msra.mxu1 %vm217_vm2, %v1634_v20 }
 0xd16   :  { %2295 = vmatprep.subr.mxu1 %v4458_v26 }
 0xd18   :  { %3487 = vmatmul.mubr.msk.f32.vlgmr.msra.gmra.mxu1 %vm217_vm2, %v4284_v39 }
 0xd19   :  { %2296 = vmatpush1.xpose.msra.mxu1 %v4460_v28 }
 0xd98   :  { %v1587_v40 = vpop.f32.mrf.mxu1 }
 0xd99   :  { %v1592_v41 = vrot.slane %v1587_v40, 2 }
 0xd9a   :  { %v3702_v42 = vpop.f32.mrf.mxu1 }
 0xd9b   :  { %v1594_v44 = vadd.f32 %v1592_v41, %v4234_v14  ;;  %v2242_v14 = vmax.f32 %v2078_v54, 0.0 }
 0xd9d   :  { %3784 = vtanh.f32 %v1594_v44 }
 0xdaa   :  { %v3785_v53 = vpop.eup %3784 }
 0xdab   :  { %v1601_v55 = vsel %vm857_vm5, %v4398_v47, %v3785_v53  ;;  %v1709_v47 = vsub.s32 2, %v4465_v30  ;;  %v2443_v30 = vrot.slane %v4460_v28, 4 }
 0xdac   :  { %3452 = vmatprep.mubr.msk.f32.mxu0 %vm217_vm2, %v1601_v55  ;;  %3488 = vmatprep.mubr.msk.f32.mxu1 %vm217_vm2, %v1601_v55 }
 0xdad   :  { %3453 = vmatmul.mubr.msk.f32.gmra.mxu0 %vm217_vm2, %v1601_v55  ;;  %3489 = vmatmul.mubr.msk.f32.gmra.mxu1 %vm217_vm2, %v1601_v55  ;;  %v1710_v58 = vrot.slane %v1697_v50, %v1709_v47 }
 0xdae   :  { %2329 = vmatprep.mubr.f32.mxu1 %v2243_v56  ;;  %2229 = vmatprep.mubr.f32.mxu0 %v3930_v0 }
 0xdb1   :  { %3297 = vmatmul.mubr.msk.f32.vlgmr.msra.gmra.mxu0 %vm217_vm2, %v4284_v39  ;;  %2330 = vmatmul.mubr.f32.vlgmr.msra.gmra.mxu1 %v2242_v14  ;;  %v4489_v39 = vld [vmem:[#allocation7 + $0x10] sm:$0xff] }
 0xdb2   :  { %2235 = vmatprep.mubr.f32.mxu0 %v3930_v0  ;;  %v2444_v0 = vrot.slane %v4458_v26, 4  ;;  %3703 = vmatprep.subr.msk.mxu1 %vm217_vm2, %v4489_v39  ;;  %v2445_v33 = vrot.slane %v4489_v39, 4 }
 0xdb3   :  { %3704 = vmatpush3.xpose.msk.msra.mxu1 %vm217_vm2, %v4489_v39  ;;  %v2728_v39 = vld [vmem:[%s4649_s5 + $0x88] sm:$0xff] }
 0xdb4   :  { %2484 = vmatprep.subr.mxu1 %v2444_v0 }
 0xdb5   :  { %3298 = vmatmul.mubr.msk.f32.gmra.mxu0 %vm217_vm2, %v1601_v55 }
 0xdd8   :  { %v2154_v60 = vpop.f32.mrf.mxu1 }
 0xdd9   :  { %v2155_v61 = vadd.f32 %v2154_v60, %v1710_v58 }
 0xdda   :  { %v2156_v62 = vpop.f32.mrf.mxu1 }
 0xddb   :  { %v2157_v63 = vadd.f32 %v2156_v62, %v1714_v59  ;;  %v2244_v1 = vmax.f32 %v2155_v61, 0.0 }
 0xddd   :  { %v2248_v2 = vmax.f32 %v2157_v63, 0.0 }
 0xddf   :  { %v3744_v3 = vpack.i.bf16 %v2244_v1, %v2248_v2 }
 0xde1   :  { %3745 = vrot.lane.b32.xlu0 %v3744_v3, %s3933_s21 }
 0xe6d   :  { %v2083_v5 = vpop.f32.mrf.mxu0  ;;  %v2160_v6 = vpop.f32.mrf.mxu1 }
 0xe6e   :  { %v2161_v8 = vadd.f32 %v2160_v6, %v1710_v58  ;;  %v2084_v10 = vadd.f32 %v2083_v5, %v1702_v49 }
 0xe6f   :  { %v2085_v11 = vpop.f32.mrf.mxu0  ;;  %v2162_v12 = vpop.f32.mrf.mxu1 }
 0xe70   :  { %v2086_v13 = vadd.f32 %v2085_v11, %v1706_v51  ;;  %v2163_v15 = vadd.f32 %v2162_v12, %v1714_v59  ;;  %v2247_v19 = vmax.f32 %v2161_v8, 0.0  ;;  %v2245_v23 = vmax.f32 %v2084_v10, 0.0 }
 0xe71   :  { %v2231_v16 = vpop.f32.mrf.mxu0  ;;  %v4497_v17 = vpop.f32.mrf.mxu1 }
 0xe72   :  { %v2246_v20 = vmax.f32 %v2086_v13, 0.0  ;;  %v2250_v21 = vmax.f32 %v2163_v15, 0.0  ;;  %v2232_v22 = vadd.f32 %v2231_v16, %v1718_v9 }
 0xe73   :  { %v2233_v24 = vpop.f32.mrf.mxu0  ;;  %v2333_v25 = vpop.f32.mrf.mxu1 }
 0xe74   :  { %v3749_v26 = vpack.i.bf16 %v2247_v19, %v2250_v21  ;;  %2334 = vmatprep.mubr.f32.mxu1 %v2246_v20  ;;  %v2249_v27 = vmax.f32 %v2232_v22, 0.0  ;;  %v2234_v31 = vadd.f32 %v2233_v24, %v1722_v18  ;;  %v2609_v35 = vsel %vm2608_vm6, %v2232_v22, 0.0  ;;  %v2676_v24 = vpop.permute.xlu0 %2675  ;;  %v2697_v25 = vpop.permute.xlu1 %2696 }
 0xe75   :  { %v2237_v29 = vpop.f32.mrf.mxu0  ;;  %2335 = vmatmul.mubr.f32.gmra.mxu1 %v2245_v23 }
 0xe76   :  { %v2238_v32 = vadd.f32 %v2237_v29, %v1718_v9  ;;  %3750 = vrot.lane.b32.xlu0 %v3749_v26, %s3933_s21  ;;  %2424 = vrot.lane.b32.xlu1 %v2249_v27, %s3933_s21  ;;  %v2618_v28 = vsel %vm2432_vm7, %v2234_v31, 0.0 }
 0xe77   :  { %3705 = vmatprep.mubr.msk.f32.mxu1 %vm217_vm2, %v2244_v1  ;;  %v2239_v34 = vpop.f32.mrf.mxu0 }
 0xe78   :  { %v2610_v36 = vsel %vm2608_vm6, %v2238_v32, 0.0  ;;  %v2240_v37 = vadd.f32 %v2239_v34, %v1722_v18  ;;  %v2251_v38 = vmax.f32 %v2238_v32, 0.0 }
 0xe79   :  { %v2611_v40 = vadd.f32 %v2610_v36, %v2609_v35  ;;  %3706 = vmatmul.mubr.msk.f32.vlgmr.msra.gmra.mxu1 %vm217_vm2, %v2247_v19  ;;  %v2699_v36 = vpop.permute.xlu1 %2698 }
 0xe7a   :  { %v2619_v41 = vsel %vm2432_vm7, %v2240_v37, 0.0  ;;  %2430 = vrot.lane.b32.xlu1 %v2251_v38, %s3933_s21  ;;  %2485 = vmatpush1.xpose.msra.mxu1 %v2443_v30 }
 0xe7b   :  { %v2612_v42 = vrot.slane %v2611_v40, 4  ;;  %v2620_v44 = vadd.f32 %v2619_v41, %v2618_v28  ;;  %3708 = vmatprep.subr.msk.mxu1 %vm217_vm2, %v2445_v33 }
 0xe7d   :  { %v2613_v45 = vadd.f32 %v2612_v42, %v2611_v40  ;;  %v2621_v46 = vrot.slane %v2620_v44, 4  ;;  %v2700_v42 = vsel %vm2679_vm8, %v2697_v25, %v2699_v36 }
 0xe7f   :  { %v2614_v48 = vrot.slane %v2613_v45, 2  ;;  %v2622_v50 = vadd.f32 %v2621_v46, %v2620_v44 }
 0xe81   :  { %v2615_v51 = vadd.f32 %v2614_v48, %v2613_v45  ;;  %v2623_v43 = vrot.slane %v2622_v50, 2 }
 0xe83   :  { %v2616_v49 = vrot.slane %v2615_v51, 1  ;;  %v2624_v52 = vadd.f32 %v2623_v43, %v2622_v50 }
 0xe85   :  { %v2617_v53 = vadd.f32 %v2616_v49, %v2615_v51  ;;  %v2625_v54 = vrot.slane %v2624_v52, 1 }
 0xe87   :  { %v2628_v55 = vmul.f32 0.0625, %v2617_v53  ;;  %v2626_v56 = vadd.f32 %v2625_v54, %v2624_v52 }
 0xe89   :  { %v2630_v14 = vsub.f32 %v2232_v22, %v2628_v55  ;;  %v2632_v47 = vsub.f32 %v2238_v32, %v2628_v55  ;;  %v2629_v57 = vmul.f32 0.0625, %v2626_v56 }
 0xe8b   :  { %v2634_v58 = vmul.f32 %v2630_v14, %v2630_v14  ;;  %v2636_v59 = vmul.f32 %v2632_v47, %v2632_v47  ;;  %v2631_v60 = vsub.f32 %v2234_v31, %v2629_v57  ;;  %v2633_v61 = vsub.f32 %v2240_v37, %v2629_v57  ;;  %v2678_v31 = vpop.permute.xlu0 %2677 }
 0xe8c   :  { %v2680_v38 = vsel %vm2679_vm8, %v2676_v24, %v2678_v31  ;;  %v2896_v31 = vld [vmem:[#allocation9 + $0x10] sm:$0xff] }
 0xe8d   :  { %v2638_v62 = vsel %vm2608_vm6, %v2634_v58, 0.0  ;;  %v2639_v63 = vsel %vm2608_vm6, %v2636_v59, 0.0  ;;  %v2635_v1 = vmul.f32 %v2631_v60, %v2631_v60  ;;  %v2637_v2 = vmul.f32 %v2633_v61, %v2633_v61  ;;  %v2730_v58 = vld [vmem:[%s4649_s5 + $0x98] sm:$0xff] }
 0xe8e   :  { %v2640_v3 = vadd.f32 %v2639_v63, %v2638_v62  ;;  %v2729_v62 = vld [vmem:[%s4649_s5 + $0x90] sm:$0xff]  ;;  %v2726_v63 = vld [vmem:[%s4649_s5 + $0x78] sm:$0xff] }
 0xe8f   :  { %v2647_v0 = vsel %vm2432_vm7, %v2635_v1, 0.0  ;;  %v2648_v4 = vsel %vm2432_vm7, %v2637_v2, 0.0  ;;  %v3746_v49 = vpop.permute.xlu0 %3745  ;;  %v2725_v1 = vld [vmem:[%s4649_s5 + $0x70] sm:$0xff]  ;;  %v2724_v2 = vld [vmem:[%s4649_s5 + $0x68] sm:$0xff] }
 0xe90   :  { %v2641_v5 = vrot.slane %v2640_v3, 4  ;;  %v2649_v6 = vadd.f32 %v2648_v4, %v2647_v0  ;;  %v3748_v52 = vunpack.i.h.bf16 %v3746_v49  ;;  %v3747_v53 = vunpack.i.l.bf16 %v3746_v49  ;;  %v2722_v0 = vld [vmem:[%s4649_s5 + $0x58] sm:$0xff]  ;;  %v2721_v4 = vld [vmem:[%s4649_s5 + $0x50] sm:$0xff] }
 0xe92   :  { %v2642_v7 = vadd.f32 %v2641_v5, %v2640_v3  ;;  %v2650_v8 = vrot.slane %v2649_v6, 4  ;;  %v2433_v57 = vsel %vm2432_vm7, %v3748_v52, %v3747_v53  ;;  %v2723_v3 = vld [vmem:[%s4649_s5 + $0x60] sm:$0xff]  ;;  %v2720_v5 = vld [vmem:[%s4649_s5 + $0x48] sm:$0xff] }
 0xe94   :  { %v2643_v9 = vrot.slane %v2642_v7, 2  ;;  %v2651_v10 = vadd.f32 %v2650_v8, %v2649_v6  ;;  %v2719_v6 = vld [vmem:[%s4649_s5 + $0x40] sm:$0xff]  ;;  %v2717_v8 = vld [vmem:[%s4649_s5 + $0x30] sm:$0xff] }
 0xe96   :  { %v2644_v11 = vadd.f32 %v2643_v9, %v2642_v7  ;;  %v2652_v12 = vrot.slane %v2651_v10, 2  ;;  %v2718_v7 = vld [vmem:[%s4649_s5 + $0x38] sm:$0xff]  ;;  %v2716_v9 = vld [vmem:[%s4649_s5 + $0x28] sm:$0xff] }
 0xe98   :  { %v2645_v13 = vrot.slane %v2644_v11, 1  ;;  %v2653_v15 = vadd.f32 %v2652_v12, %v2651_v10  ;;  %v2715_v10 = vld [vmem:[%s4649_s5 + $0x20] sm:$0xff]  ;;  %v2713_v12 = vld [vmem:[%s4649_s5 + $0x10] sm:$0xff] }
 0xe9a   :  { %v2646_v16 = vadd.f32 %v2645_v13, %v2644_v11  ;;  %v2654_v18 = vrot.slane %v2653_v15, 1  ;;  %v2714_v11 = vld [vmem:[%s4649_s5 + $0x18] sm:$0xff]  ;;  %v2712_v13 = vld [vmem:[%s4649_s5 + $0x8] sm:$0xff] }
 0xe9c   :  { %v2656_v19 = vmul.f32 0.0625, %v2646_v16  ;;  %v2655_v20 = vadd.f32 %v2654_v18, %v2653_v15  ;;  %v2711_v15 = vld [vmem:[%s4649_s5] sm:$0xff] }
 0xe9e   :  { %v2658_v21 = vadd.f32 1e-05, %v2656_v19  ;;  %v2657_v22 = vmul.f32 0.0625, %v2655_v20 }
 0xea0   :  { %3786 = vrsqrt.f32 %v2658_v21  ;;  %v2659_v23 = vadd.f32 1e-05, %v2657_v22 }
 0xea2   :  { %3788 = vrsqrt.f32 %v2659_v23 }
 0xead   :  { %v3787_v26 = vpop.eup %3786 }
 0xeae   :  { %v2664_v27 = vmul.f32 %v3787_v26, %v2632_v47  ;;  %v2662_v29 = vmul.f32 %v3787_v26, %v2630_v14 }
 0xeaf   :  { %v3789_v30 = vpop.eup %3788 }
 0xeb0   :  { %v2665_v32 = vmul.f32 %v3789_v30, %v2633_v61  ;;  %v2683_v34 = vmul.f32 %v2676_v24, %v2662_v29  ;;  %v2685_v35 = vmul.f32 %v2676_v24, %v2664_v27  ;;  %v2663_v37 = vmul.f32 %v3789_v30, %v2631_v60  ;;  %v4606_v24 = vld [vmem:[#allocation10 + $0x3] ss:$0 sm:$0xff]  ;;  %v2897_v30 = vld [vmem:[#allocation9 + $0x18] sm:$0x3f] }
 0xeb2   :  { %v2703_v40 = vadd.f32 %v2697_v25, %v2683_v34  ;;  %v2684_v28 = vmul.f32 %v2680_v38, %v2663_v37  ;;  %v2686_v41 = vmul.f32 %v2680_v38, %v2665_v32  ;;  %v2705_v44 = vadd.f32 %v2697_v25, %v2685_v35  ;;  %v2895_v34 = vld [vmem:[#allocation9 + $0x8] sm:$0xff]  ;;  %v2894_v37 = vld [vmem:[#allocation9] sm:$0xff] }
 0xeb4   :  { %v2704_v45 = vadd.f32 %v2700_v42, %v2684_v28  ;;  %v2707_v46 = vmax.f32 %v2703_v40, 0.0  ;;  %v2706_v48 = vadd.f32 %v2700_v42, %v2686_v41  ;;  %v2709_v51 = vmax.f32 %v2705_v44, 0.0  ;;  %v2415_v40 = vld [vmem:[#allocation10 + $0x4] ss:$0 sm:$0xff] }
 0xeb6   :  { %v2708_v50 = vmax.f32 %v2704_v45, 0.0  ;;  %2736 = vrot.lane.b32.xlu0 %v2707_v46, %s3932_s0  ;;  %v2710_v43 = vmax.f32 %v2706_v48, 0.0 }
 0xeb8   :  { %2738 = vrot.lane.b32.xlu1 %v2708_v50, %s3932_s0  ;;  %v2731_v50 = vld [vmem:[#allocation10 + $0x7] ss:$0 sm:$0xff] }
 0xeba   :  { %2740 = vrot.lane.b32.xlu0 %v2709_v51, %s3932_s0 }
 0xebc   :  { %2742 = vrot.lane.b32.xlu1 %v2710_v43, %s3932_s0 }
 0xee8   :  { %v3751_v54 = vpop.permute.xlu0 %3750  ;;  %v2425_v55 = vpop.permute.xlu1 %2424 }
 0xee9   :  { %v2434_v56 = vsel %vm2432_vm7, %v3747_v53, %v2425_v55  ;;  %v3753_v14 = vunpack.i.h.bf16 %v3751_v54  ;;  %v3752_v47 = vunpack.i.l.bf16 %v3751_v54 }
 0xeea   :  { %2518 = vmatprep.mubr.f32.mxu1 %v2434_v56 }
 0xeeb   :  { %2519 = vmatmul.mubr.f32.vlgmr.msra.gmra.mxu1 %v2433_v57  ;;  %v2435_v61 = vsel %vm2432_vm7, %v3753_v14, %v3752_v47 }
 0xeec   :  { %v2431_v59 = vpop.permute.xlu1 %2430  ;;  %3709 = vmatpush3.xpose.msk.msra.mxu1 %vm217_vm2, %v2445_v33  ;;  %v2727_v33 = vld [vmem:[%s4649_s5 + $0x80] sm:$0xff]  ;;  %s3934_s5 = smov 4  }
 0xeed   :  { %v2436_v60 = vsel %vm2432_vm7, %v3752_v47, %v2431_v59  ;;  %3305 = vmatprep.subr.msk.mxu1 %vm217_vm2, %v2730_v58 }
 0xeee   :  { %2523 = vmatprep.mubr.f32.mxu1 %v2436_v60 }
 0xeef   :  { %2524 = vmatmul.mubr.f32.gmra.mxu1 %v2435_v61 }
 0xef0   :  { %3710 = vmatprep.mubr.msk.f32.mxu1 %vm217_vm2, %v2425_v55 }
 0xef3   :  { %3711 = vmatmul.mubr.msk.f32.vlgmr.msra.gmra.mxu1 %vm217_vm2, %v2431_v59 }
 0xef4   :  { %2795 = vmatpush1.xpose.msra.mxu1 %v2729_v62 }
 0xef5   :  { %3306 = vmatprep.subr.msk.mxu1 %vm217_vm2, %v2728_v39 }
 0xef8   :  { %2797 = vmatpush1.xpose.msra.mxu1 %v2727_v33 }
 0xef9   :  { %3307 = vmatprep.subr.msk.mxu1 %vm217_vm2, %v2726_v63 }
 0xefc   :  { %2799 = vmatpush1.xpose.msra.mxu1 %v2725_v1 }
 0xefd   :  { %3308 = vmatprep.subr.msk.mxu1 %vm217_vm2, %v2724_v2 }
 0xf00   :  { %2801 = vmatpush1.xpose.msra.mxu1 %v2723_v3 }
 0xf01   :  { %3309 = vmatprep.subr.msk.mxu1 %vm217_vm2, %v2722_v0 }
 0xf04   :  { %2803 = vmatpush1.xpose.msra.mxu1 %v2721_v4 }
 0xf05   :  { %3310 = vmatprep.subr.msk.mxu1 %vm217_vm2, %v2720_v5 }
 0xf08   :  { %2805 = vmatpush1.xpose.msra.mxu1 %v2719_v6 }
 0xf09   :  { %3311 = vmatprep.subr.msk.mxu1 %vm217_vm2, %v2718_v7 }
 0xf0c   :  { %2807 = vmatpush1.xpose.msra.mxu1 %v2717_v8 }
 0xf0d   :  { %3312 = vmatprep.subr.msk.mxu1 %vm217_vm2, %v2716_v9 }
 0xf10   :  { %2809 = vmatpush1.xpose.msra.mxu1 %v2715_v10 }
 0xf11   :  { %3313 = vmatprep.subr.msk.mxu1 %vm217_vm2, %v2714_v11 }
 0xf14   :  { %2811 = vmatpush1.xpose.msra.mxu1 %v2713_v12 }
 0xf15   :  { %3314 = vmatprep.subr.msk.mxu1 %vm217_vm2, %v2712_v13  ;;  %v2857_v13 = vld [vmem:[#allocation10 + $0x30] ss:$0 sm:$0xff] }
 0xf18   :  { %2813 = vmatpush1.xpose.msra.mxu1 %v2711_v15 }
 0xf19   :  { %3713 = vmatprep.subr.msk.mxu1 %vm2859_vm9, %v2897_v30 }
 0xf28   :  { %v2737_v16 = vpop.permute.xlu0 %2736 }
 0xf2a   :  { %v2739_v18 = vpop.permute.xlu1 %2738 }
 0xf2b   :  { %v2744_v19 = vsel %vm2679_vm8, %v2737_v16, %v2739_v18  ;;  %3315 = vmatprep.mubr.msk.f32.mxu1 %vm217_vm2, %v2739_v18  ;;  %v2858_v18 = vld [vmem:[#allocation10 + $0x31] ss:$0 sm:$0xff] }
 0xf2c   :  { %2847 = vmatmul.mubr.f32.vlgmr.msra.gmra.mxu1 %v2744_v19  ;;  %v2741_v20 = vpop.permute.xlu0 %2740 }
 0xf2d   :  { %3714 = vmatpush3.xpose.msk.msra.mxu1 %vm2859_vm9, %v2897_v30  ;;  %v2898_v30 = vld [vmem:[#allocation10 + $0x32] ss:$0 sm:$0xff] }
 0xf2e   :  { %v2743_v21 = vpop.permute.xlu1 %2742  ;;  %3715 = vmatprep.subr.msk.mxu1 %vm2859_vm9, %v2896_v31 }
 0xf2f   :  { %3316 = vmatprep.mubr.msk.f32.mxu1 %vm217_vm2, %v2743_v21  ;;  %v2745_v22 = vsel %vm2679_vm8, %v2741_v20, %v2743_v21 }
 0xf30   :  { %2852 = vmatmul.mubr.f32.gmra.mxu1 %v2745_v22 }
 0xf31   :  { %3716 = vmatpush3.xpose.msk.msra.mxu1 %vm2859_vm9, %v2896_v31 }
 0xf32   :  { %3717 = vmatprep.subr.msk.mxu1 %vm2859_vm9, %v2895_v34 }
 0xf35   :  { %v2336_v23 = vpop.f32.mrf.mxu1  ;;  %3718 = vmatpush3.xpose.msk.msra.mxu1 %vm2859_vm9, %v2895_v34 }
 0xf36   :  { %v2337_v26 = vadd.f32 %v2336_v23, %v4606_v24  ;;  %3719 = vmatprep.subr.msk.mxu1 %vm2859_vm9, %v2894_v37 }
 0xf37   :  { %v2338_v25 = vpop.f32.mrf.mxu1 }
 0xf39   :  { %v3707_v27 = vpop.f32.mrf.mxu1  ;;  %3720 = vmatpush3.xpose.msk.msra.mxu1 %vm2859_vm9, %v2894_v37 }
 0xf3a   :  { %v4609_v29 = vadd.f32 %v3707_v27, %v2337_v26  ;;  %v2992_v26 = vld [vmem:[%s4651_s7] sm:$0x7f] }
 0xf3b   :  { %v4615_v32 = vpop.f32.mrf.mxu1  ;;  %3724 = vmatprep.subr.msk.mxu1 %vm2994_vm10, %v2992_v26 }
 0xfab   :  { %v2520_v35 = vpop.f32.mrf.mxu1 }
 0xfac   :  { %v2521_v44 = vadd.f32 %v2520_v35, %v2415_v40 }
 0xfad   :  { %v2522_v36 = vpop.f32.mrf.mxu1 }
 0xfae   :  { %v2993_v36 = vld [vmem:[#allocation10 + $0x33] ss:$0 sm:$0xff] }
 0xfaf   :  { %v2525_v38 = vpop.f32.mrf.mxu1 }
 0xfb0   :  { %v2526_v41 = vadd.f32 %v2525_v38, %v2415_v40 }
 0xfb1   :  { %v2527_v28 = vpop.f32.mrf.mxu1 }
 0xfb3   :  { %v3712_v42 = vpop.f32.mrf.mxu1 }
 0xfb4   :  { %v2601_v45 = vadd.f32 %v3712_v42, %v2526_v41  ;;  %v2332_v42 = vadd.f32 %v4497_v17, %v4606_v24 }
 0xfb5   :  { %v2595_v46 = vpop.f32.mrf.mxu1 }
 0xfb6   :  { %v2596_v48 = vadd.f32 %v2595_v46, %v2521_v44  ;;  %3083 = vrot.lane.b32.xlu1 %v2601_v45, %s3934_s5  ;;  %v2407_v45 = vadd.f32 %v4615_v32, %v2332_v42 }
 0xfb8   :  { %3081 = vrot.lane.b32.xlu0 %v2596_v48, %s3934_s5 }
 0xfec   :  { %v2848_v51 = vpop.f32.mrf.mxu1 }
 0xfed   :  { %v2849_v49 = vadd.f32 %v2848_v51, %v2731_v50 }
 0xfee   :  { %v2850_v43 = vpop.f32.mrf.mxu1 }
 0xfef   :  { %v2860_v55 = vsel %vm2859_vm9, %v2849_v49, 0.0 }
 0xff0   :  { %v2853_v52 = vpop.f32.mrf.mxu1 }
 0xff1   :  { %v2854_v53 = vadd.f32 %v2853_v52, %v2731_v50 }
 0xff2   :  { %v2855_v54 = vpop.f32.mrf.mxu1 }
 0xff3   :  { %v2861_v56 = vsel %vm2859_vm9, %v2854_v53, 0.0 }
 0xff4   :  { %v2862_v14 = vadd.f32 %v2861_v56, %v2860_v55 }
 0xff6   :  { %v2863_v47 = vrot.slane %v2862_v14, 4 }
 0xff8   :  { %v2864_v57 = vadd.f32 %v2863_v47, %v2862_v14 }
 0xffa   :  { %v2865_v58 = vrot.slane %v2864_v57, 2 }
 0xffc   :  { %v2866_v59 = vadd.f32 %v2865_v58, %v2864_v57 }
 0xffe   :  { %v2867_v60 = vrot.slane %v2866_v59, 1 }
0x1000   :  { %v2868_v61 = vadd.f32 %v2867_v60, %v2866_v59 }
0x1002   :  { %v2869_v62 = vmul.f32 0.0625, %v2868_v61 }
0x1004   :  { %v2870_v39 = vsub.f32 %v2849_v49, %v2869_v62  ;;  %v2871_v33 = vsub.f32 %v2854_v53, %v2869_v62 }
0x1006   :  { %v2872_v63 = vmul.f32 %v2870_v39, %v2870_v39  ;;  %v2873_v1 = vmul.f32 %v2871_v33, %v2871_v33 }
0x1008   :  { %v2874_v2 = vsel %vm2859_vm9, %v2872_v63, 0.0  ;;  %v2875_v3 = vsel %vm2859_vm9, %v2873_v1, 0.0 }
0x1009   :  { %v2876_v0 = vadd.f32 %v2875_v3, %v2874_v2 }
0x100b   :  { %v2877_v4 = vrot.slane %v2876_v0, 4 }
0x100d   :  { %v2878_v5 = vadd.f32 %v2877_v4, %v2876_v0 }
0x100f   :  { %v2879_v6 = vrot.slane %v2878_v5, 2 }
0x1011   :  { %v2880_v7 = vadd.f32 %v2879_v6, %v2878_v5 }
0x1013   :  { %v2881_v8 = vrot.slane %v2880_v7, 1 }
0x1015   :  { %v2882_v9 = vadd.f32 %v2881_v8, %v2880_v7 }
0x1017   :  { %v2883_v10 = vmul.f32 0.0625, %v2882_v9 }
0x1019   :  { %v2884_v11 = vadd.f32 1e-05, %v2883_v10 }
0x101b   :  { %3790 = vrsqrt.f32 %v2884_v11 }
0x1028   :  { %v3791_v12 = vpop.eup %3790  ;;  %v3084_v41 = vpop.permute.xlu1 %3083 }
0x1029   :  { %v2886_v15 = vmul.f32 %v3791_v12, %v2870_v39  ;;  %v2887_v16 = vmul.f32 %v3791_v12, %v2871_v33  ;;  %v3097_v46 = vsel %vm3095_vm11, %v4609_v29, %v3084_v41 }
0x102a   :  { %v3082_v44 = vpop.permute.xlu0 %3081 }
0x102b   :  { %v2888_v19 = vmul.f32 %v2886_v15, %v2857_v13  ;;  %v2889_v20 = vmul.f32 %v2887_v16, %v2857_v13  ;;  %v3096_v51 = vsel %vm3095_vm11, %v2407_v45, %v3082_v44 }
0x102d   :  { %v2891_v21 = vadd.f32 %v2889_v20, %v2858_v18  ;;  %v2890_v22 = vadd.f32 %v2888_v19, %v2858_v18 }
0x102f   :  { %v2893_v23 = vmax.f32 %v2891_v21, 0.0  ;;  %v2892_v25 = vmax.f32 %v2890_v22, 0.0 }
0x1031   :  { %3721 = vmatprep.mubr.msk.f32.mxu1 %vm2859_vm9, %v2892_v25 }
0x1032   :  { %3722 = vmatmul.mubr.msk.f32.vlgmr.msra.gmra.mxu1 %vm2859_vm9, %v2893_v23 }
0x1033   :  { %3725 = vmatpush3.xpose.msk.msra.mxu1 %vm2994_vm10, %v2992_v26 }
0x10f2   :  { %v3723_v27 = vpop.f32.mrf.mxu1 }
0x10f3   :  { %v2989_v35 = vadd.f32 %v3723_v27, %v2898_v30 }
0x10f4   :  { %v2983_v31 = vpop.f32.mrf.mxu1 }
0x10f5   :  { %v2984_v34 = vadd.f32 %v2983_v31, %v2898_v30 }
0x10f7   :  { %3726 = vmatprep.mubr.msk.f32.mxu1 %vm2994_vm10, %v2984_v34 }
0x10f8   :  { %3727 = vmatmul.mubr.msk.f32.vlgmr.msra.gmra.mxu1 %vm2994_vm10, %v2989_v35 }
0x11b8   :  { %v3728_v37 = vpop.f32.mrf.mxu1 }
0x11b9   :  { %v3076_v38 = vadd.f32 %v3728_v37, %v2993_v36 }
0x11ba   :  { %v3070_v40 = vpop.f32.mrf.mxu1 }
0x11bb   :  { %v3071_v28 = vadd.f32 %v3070_v40, %v2993_v36  ;;  %3091 = vrot.lane.b32.xlu1 %v3076_v38, %s3923_s15 }
0x11bd   :  { %3089 = vrot.lane.b32.xlu0 %v3071_v28, %s3923_s15 }
0x122d   :  { %v3092_v48 = vpop.permute.xlu1 %3091 }
0x122e   :  { %v3100_v50 = vsel %vm3098_vm12, %v3097_v46, %v3092_v48 }
0x122f   :  { %3102 = vst.msk [vmem:[%s4653_s9 + $0x8] sm:$0xff] %vm123_vm1, %v3100_v50  ;;  %v3090_v43 = vpop.permute.xlu0 %3089 }
0x1230   :  { %v3099_v49 = vsel %vm3098_vm12, %v3096_v51, %v3090_v43 }
0x1231   :  { %3101 = vst.msk [vmem:[%s4653_s9] sm:$0xff] %vm123_vm1, %v3099_v49 }
0x1232   :  { %3107 = vsyncpa [#allocation3], 1 }
0x1233   :  { %3108 = vsyncpa [#allocation5], 1 }
0x1234   :  { %3109 = vsyncpa [#allocation8], 1 }
0x1235   :  { %3110 = vsyncpa [#allocation11], 1 }

</bundles_post_ra>
